<compile_context>
chip_gen: v7x
topology: tpu7x:2x2x1
jax: 0.10.0
libtpu: 0.0.40
codegen_flags: <defaults>
</compile_context>

<pallas_src>
import jax
import jax.numpy as jnp
from jax.experimental import pallas as pl
from jax.experimental.pallas import tpu as pltpu


def rup(x, m):
    """Round x up to a multiple of m."""
    return (x + m - 1) // m * m


def critic_forward(state, action, params, *, n_quantiles, n_chunks=2):
    """state (B,S) f32, action (B,A) f32, params from init_params.

    Returns (B, n_nets, n_quantiles) f32, matching torch.stack(..., dim=1).
    """
    B, S = state.shape
    A = action.shape[1]
    wpack, bpack = params["wpack"], params["bpack"]
    w2q, w3q = params["w2q"], params["w3q"]
    n_nets, _, H = w2q.shape
    Q = n_quantiles
    C = H // n_chunks
    R, NR = wpack.shape[1], bpack.shape[1]

    # Row offsets inside the packed buffers (bf16 rows aligned to 16 sublanes).
    W1S_R = 0
    W1A_R = rup(S, 16)
    W4_R = rup(S, 16) + rup(A, 16)
    B1_R, B3_R, B4_R, B2_R0 = 0, 1, 2, 3

    def kernel(st_ref, ac_ref, wpack_ref, bpack_ref, w2q_ref, w3q_ref,
               out_ref, h1_s, acc3_s):
        # grid = (net i, hidden-chunk k); per-net small tensors + state/action
        # have constant-in-k index maps so they stay resident across chunks.
        k = pl.program_id(1)

        @pl.when(k == 0)
        def _():
            # Layer 1: concat(state, action) folded into two small matmuls.
            st = st_ref[...].astype(jnp.bfloat16)
            ac = ac_ref[...].astype(jnp.bfloat16)
            w1s = wpack_ref[0, W1S_R:W1S_R + S, :]          # (S, H) bf16
            w1a = wpack_ref[0, W1A_R:W1A_R + A, :]          # (A, H) bf16
            b1 = bpack_ref[0, B1_R:B1_R + 1, :]             # (1, H) f32
            h1 = (jnp.dot(st, w1s, preferred_element_type=jnp.float32)
                  + jnp.dot(ac, w1a, preferred_element_type=jnp.float32)
                  + b1)
            h1_s[...] = jnp.maximum(h1, 0.0).astype(jnp.bfloat16)
            acc3_s[...] = jnp.zeros_like(acc3_s)

        # Layer 2 column chunk + layer 3 row chunk (scale-folded int8 units).
        # int8 -> bf16 is exact (|q| <= 127); matmuls run bf16 on the MXU with
        # f32 accumulation; all dequant scales were folded at pack time.
        w2c = w2q_ref[0].astype(jnp.float32).astype(jnp.bfloat16)   # (H, C)
        b2c = bpack_ref[0, pl.ds(B2_R0 + k, 1), 0:C]                # (1, C) = b2/s2 chunk
        h2 = jnp.maximum(
            jnp.dot(h1_s[...], w2c, preferred_element_type=jnp.float32) + b2c,
            0.0)
        w3c = w3q_ref[0].astype(jnp.float32).astype(jnp.bfloat16)   # (C, H)
        acc3_s[...] += jnp.dot(h2.astype(jnp.bfloat16), w3c,
                               preferred_element_type=jnp.float32)

        @pl.when(k == n_chunks - 1)
        def _():
            # Finalize layer 3, then last fc (w4 stored transposed, (Q, H)).
            b3 = bpack_ref[0, B3_R:B3_R + 1, :]                     # b3 / s3
            h3 = jnp.maximum(acc3_s[...] + b3, 0.0).astype(jnp.bfloat16)
            w4t = wpack_ref[0, W4_R:W4_R + Q, :]                    # (Q, H) = (s3*w4)^T
            b4 = bpack_ref[0, B4_R:B4_R + 1, 0:Q]                   # (1, Q)
            q = jax.lax.dot_general(
                h3, w4t, (((1,), (1,)), ((), ())),
                preferred_element_type=jnp.float32) + b4
            out_ref[0] = q.astype(out_ref.dtype)                    # dense (B, Q) write

    out = pl.pallas_call(
        kernel,
        out_shape=jax.ShapeDtypeStruct((n_nets, B, Q), jnp.float32),
        grid_spec=pltpu.PrefetchScalarGridSpec(
            num_scalar_prefetch=0,
            grid=(n_nets, n_chunks),
            in_specs=[
                pl.BlockSpec((B, S), lambda i, k: (0, 0)),        # state (shared)
                pl.BlockSpec((B, A), lambda i, k: (0, 0)),        # action (shared)
                pl.BlockSpec((1, R, H), lambda i, k: (i, 0, 0)),  # packed small weights
                pl.BlockSpec((1, NR, H), lambda i, k: (i, 0, 0)), # packed biases
                pl.BlockSpec((1, H, C), lambda i, k: (i, 0, k)),  # w2 int8 column chunk
                pl.BlockSpec((1, C, H), lambda i, k: (i, k, 0)),  # w3 int8 row chunk
            ],
            out_specs=pl.BlockSpec((1, B, Q), lambda i, k: (i, 0, 0)),
            scratch_shapes=[pltpu.VMEM((B, H), jnp.bfloat16),     # h1 (per-net resident)
                            pltpu.VMEM((B, H), jnp.float32)],     # layer-3 accumulator
        ),
        compiler_params=pltpu.CompilerParams(
            dimension_semantics=("parallel", "arbitrary")),
    )(state, action, wpack, bpack, w2q, w3q)

    # (n_nets, B, Q) -> (B, n_nets, Q); 1 KB transpose in the wrapper is free.
    return jnp.transpose(out, (1, 0, 2))


def init_params(key, state_dim, action_dim, hidden, n_quantiles, n_nets,
                n_chunks=2):
    """Synthetic per-net params, packed for the kernel.

    Weight layout is (in, out) (PyTorch nn.Linear stores (out, in) -- importing
    a checkpoint needs a transpose).  w2/w3 are int8 with per-output-column
    scales folded into the downstream bias / weights.
    """
    S, A, H, Q = state_dim, action_dim, hidden, n_quantiles
    assert H % n_chunks == 0 and (H // n_chunks) % 128 == 0
    d_in = S + A

    def uinit(k, shape, fan_in):
        bound = 1.0 / (fan_in ** 0.5)
        return jax.random.uniform(k, shape, jnp.float32, -bound, bound)

    keys = jax.random.split(key, 8)
    w1 = uinit(keys[0], (n_nets, d_in, H), d_in)
    b1 = uinit(keys[1], (n_nets, H), d_in)
    w2 = uinit(keys[2], (n_nets, H, H), H)
    b2 = uinit(keys[3], (n_nets, H), H)
    w3 = uinit(keys[4], (n_nets, H, H), H)
    b3 = uinit(keys[5], (n_nets, H), H)
    w4 = uinit(keys[6], (n_nets, H, Q), H)
    b4 = uinit(keys[7], (n_nets, Q), H)

    # --- int8 quantization of w2 / w3 (per output column), scales folded ---
    s2 = jnp.maximum(jnp.max(jnp.abs(w2), axis=1), 1e-8) / 127.0     # (n_nets, H)
    w2q = jnp.clip(jnp.round(w2 / s2[:, None, :]), -127, 127).astype(jnp.int8)
    b2p = b2 / s2                                                    # bias in scaled units

    w3e = w3 * s2[:, :, None]                                        # fold s2 into w3 rows
    s3 = jnp.maximum(jnp.max(jnp.abs(w3e), axis=1), 1e-8) / 127.0
    w3q = jnp.clip(jnp.round(w3e / s3[:, None, :]), -127, 127).astype(jnp.int8)
    b3p = b3 / s3

    w4p = w4 * s3[:, :, None]                                        # fold s3 into w4 rows

    # --- pack small per-net tensors: bf16 weights (rows are H=512 wide) ---
    R = rup(S, 16) + rup(A, 16) + rup(Q, 16)
    wpack = jnp.zeros((n_nets, R, H), jnp.bfloat16)
    wpack = wpack.at[:, 0:S, :].set(w1[:, :S, :].astype(jnp.bfloat16))
    wpack = wpack.at[:, rup(S, 16):rup(S, 16) + A, :].set(
        w1[:, S:, :].astype(jnp.bfloat16))
    w4_off = rup(S, 16) + rup(A, 16)
    wpack = wpack.at[:, w4_off:w4_off + Q, :].set(
        jnp.swapaxes(w4p, 1, 2).astype(jnp.bfloat16))                # (Q, H) transposed

    # --- pack biases (f32): row0=b1, row1=b3/s3, row2=b4, rows 3.. = b2/s2 chunks ---
    C = H // n_chunks
    NR = rup(3 + n_chunks, 8)
    bpack = jnp.zeros((n_nets, NR, H), jnp.float32)
    bpack = bpack.at[:, 0, :].set(b1)
    bpack = bpack.at[:, 1, :].set(b3p)
    bpack = bpack.at[:, 2, :Q].set(b4)
    bpack = bpack.at[:, 3:3 + n_chunks, :C].set(b2p.reshape(n_nets, n_chunks, C))

    return {"wpack": wpack, "bpack": bpack, "w2q": w2q, "w3q": w3q}


def critic_reference(state, action, params, state_dim, action_dim, n_quantiles,
                     n_chunks=2):
    """Pure-JAX reference mirroring the kernel math (same dtypes / op order)."""
    wpack, bpack = params["wpack"], params["bpack"]
    w2q, w3q = params["w2q"], params["w3q"]
    n_nets, _, H = w2q.shape
    S, A, Q = state_dim, action_dim, n_quantiles
    C = H // n_chunks
    st = state.astype(jnp.bfloat16)
    ac = action.astype(jnp.bfloat16)
    outs = []
    for n in range(n_nets):
        w1s = wpack[n, 0:S, :]
        w1a = wpack[n, rup(S, 16):rup(S, 16) + A, :]
        w4_off = rup(S, 16) + rup(A, 16)
        w4t = wpack[n, w4_off:w4_off + Q, :]
        b1 = bpack[n, 0, :]
        b3p = bpack[n, 1, :]
        b4 = bpack[n, 2, :Q]
        b2p = jnp.concatenate([bpack[n, 3 + j, :C] for j in range(n_chunks)])

        h1 = jnp.maximum(
            jnp.dot(st, w1s, preferred_element_type=jnp.float32)
            + jnp.dot(ac, w1a, preferred_element_type=jnp.float32) + b1, 0.0)
        w2b = w2q[n].astype(jnp.float32).astype(jnp.bfloat16)
        h2 = jnp.maximum(
            jnp.dot(h1.astype(jnp.bfloat16), w2b,
                    preferred_element_type=jnp.float32) + b2p, 0.0)
        w3b = w3q[n].astype(jnp.float32).astype(jnp.bfloat16)
        h3 = jnp.maximum(
            jnp.dot(h2.astype(jnp.bfloat16), w3b,
                    preferred_element_type=jnp.float32) + b3p, 0.0)
        q = jnp.dot(h3.astype(jnp.bfloat16), jnp.transpose(w4t),
                    preferred_element_type=jnp.float32) + b4
        outs.append(q)
    return jnp.stack(outs, axis=1)


if __name__ == "__main__":
    state_dim, action_dim = 8, 8
    n_quantiles, n_nets = 16, 2
    hidden, batch, n_chunks = 512, 8, 2

    key = jax.random.PRNGKey(0)
    kp, ks, ka = jax.random.split(key, 3)
    params = init_params(kp, state_dim, action_dim, hidden, n_quantiles,
                         n_nets, n_chunks)
    state = jax.random.normal(ks, (batch, state_dim), jnp.float32)
    action = jax.random.normal(ka, (batch, action_dim), jnp.float32)

    forward = jax.jit(critic_forward, static_argnames=("n_quantiles", "n_chunks"))
    quantiles = forward(state, action, params,
                        n_quantiles=n_quantiles, n_chunks=n_chunks)
    jax.block_until_ready(quantiles)

    ref = critic_reference(state, action, params, state_dim, action_dim,
                           n_quantiles, n_chunks)
    assert quantiles.shape == (batch, n_nets, n_quantiles)
    max_err = float(jnp.max(jnp.abs(quantiles - ref)))
    assert jnp.allclose(quantiles, ref, atol=1e-2, rtol=1e-2), max_err

    print("KERNEL_OK")
</pallas_src>

<mosaic_0001>
module attributes {stable_mosaic.version = 11 : i64} {
  func.func @kernel(%arg0: i32, %arg1: i32, %arg2: memref<8x8xf32, #tpu.memory_space<vmem>>, %arg3: memref<8x8xf32, #tpu.memory_space<vmem>>, %arg4: memref<1x48x512xbf16, #tpu.memory_space<vmem>>, %arg5: memref<1x8x512xf32, #tpu.memory_space<vmem>>, %arg6: memref<1x512x256xi8, #tpu.memory_space<vmem>>, %arg7: memref<1x256x512xi8, #tpu.memory_space<vmem>>, %arg8: memref<1x8x16xf32, #tpu.memory_space<vmem>>, %arg9: memref<8x512xbf16, #tpu.memory_space<vmem>>, %arg10: memref<8x512xf32, #tpu.memory_space<vmem>>) attributes {dimension_semantics = [#tpu.dimension_semantics<parallel>, #tpu.dimension_semantics<arbitrary>], iteration_bounds = array<i64: 2, 2>, scalar_prefetch = 0 : i64, scratch_operands = 2 : i64, tpu.core_type = #tpu.core_type<tc>, window_params = [{pipeline_mode = #tpu.pipeline_mode<synchronous>, transform_indices = @transform_0, window_bounds = array<i64: 8, 8>}, {pipeline_mode = #tpu.pipeline_mode<synchronous>, transform_indices = @transform_1, window_bounds = array<i64: 8, 8>}, {transform_indices = @transform_2, window_bounds = array<i64: 1, 48, 512>}, {transform_indices = @transform_3, window_bounds = array<i64: 1, 8, 512>}, {transform_indices = @transform_4, window_bounds = array<i64: 1, 512, 256>}, {transform_indices = @transform_5, window_bounds = array<i64: 1, 256, 512>}, {transform_indices = @transform_6, window_bounds = array<i64: 1, 8, 16>}]} {
    %c0_i32 = arith.constant 0 : i32
    %0 = arith.cmpi eq, %arg1, %c0_i32 : i32
    %1 = arith.extui %0 : i1 to i32
    %c0_i32_0 = arith.constant 0 : i32
    %2 = arith.cmpi ne, %1, %c0_i32_0 : i32
    scf.if %2 {
      %c0_17 = arith.constant 0 : index
      %c0_18 = arith.constant 0 : index
      %29 = vector.load %arg2[%c0_17, %c0_18] : memref<8x8xf32, #tpu.memory_space<vmem>>, vector<8x8xf32>
      %30 = arith.truncf %29 : vector<8x8xf32> to vector<8x8xbf16>
      %c0_19 = arith.constant 0 : index
      %c0_20 = arith.constant 0 : index
      %31 = vector.load %arg3[%c0_19, %c0_20] : memref<8x8xf32, #tpu.memory_space<vmem>>, vector<8x8xf32>
      %32 = arith.truncf %31 : vector<8x8xf32> to vector<8x8xbf16>
      %c0_21 = arith.constant 0 : index
      %c0_22 = arith.constant 0 : index
      %c0_23 = arith.constant 0 : index
      %33 = vector.load %arg4[%c0_21, %c0_22, %c0_23] : memref<1x48x512xbf16, #tpu.memory_space<vmem>>, vector<1x8x512xbf16>
      %34 = vector.shape_cast %33 : vector<1x8x512xbf16> to vector<8x512xbf16>
      %c0_24 = arith.constant 0 : index
      %c16 = arith.constant 16 : index
      %c0_25 = arith.constant 0 : index
      %35 = vector.load %arg4[%c0_24, %c16, %c0_25] : memref<1x48x512xbf16, #tpu.memory_space<vmem>>, vector<1x8x512xbf16>
      %36 = vector.shape_cast %35 : vector<1x8x512xbf16> to vector<8x512xbf16>
      %c0_26 = arith.constant 0 : index
      %c0_27 = arith.constant 0 : index
      %c0_28 = arith.constant 0 : index
      %37 = vector.load %arg5[%c0_26, %c0_27, %c0_28] : memref<1x8x512xf32, #tpu.memory_space<vmem>>, vector<1x1x512xf32>
      %38 = vector.shape_cast %37 : vector<1x1x512xf32> to vector<1x512xf32>
      %cst_29 = arith.constant dense<0.000000e+00> : vector<8x512xf32>
      %39 = tpu.matmul %30, %34, %cst_29 {dimension_numbers = #tpu.dot_dimension_numbers<[1], [0], [0], [1], [0, 0, 1, 1], [], []>} : vector<8x8xbf16>, vector<8x512xbf16>, vector<8x512xf32> -> vector<8x512xf32>
      %cst_30 = arith.constant dense<0.000000e+00> : vector<8x512xf32>
      %40 = tpu.matmul %32, %36, %cst_30 {dimension_numbers = #tpu.dot_dimension_numbers<[1], [0], [0], [1], [0, 0, 1, 1], [], []>} : vector<8x8xbf16>, vector<8x512xbf16>, vector<8x512xf32> -> vector<8x512xf32>
      %41 = arith.addf %39, %40 : vector<8x512xf32>
      %42 = vector.broadcast %38 : vector<1x512xf32> to vector<8x512xf32>
      %43 = arith.addf %41, %42 : vector<8x512xf32>
      %cst_31 = arith.constant 0.000000e+00 : f32
      %44 = vector.broadcast %cst_31 : f32 to vector<8x512xf32>
      %45 = arith.maximumf %43, %44 : vector<8x512xf32>
      %46 = arith.truncf %45 : vector<8x512xf32> to vector<8x512xbf16>
      %c0_32 = arith.constant 0 : index
      %c0_33 = arith.constant 0 : index
      %47 = vector.load %arg9[%c0_32, %c0_33] : memref<8x512xbf16, #tpu.memory_space<vmem>>, vector<8x512xbf16>
      tpu.vector_store %arg9[%c0_32, %c0_33], %46 {strides = array<i32>} : memref<8x512xbf16, #tpu.memory_space<vmem>>, vector<8x512xbf16>,
      %cst_34 = arith.constant 0.000000e+00 : f32
      %48 = vector.broadcast %cst_34 : f32 to vector<8x512xf32>
      %c0_35 = arith.constant 0 : index
      %c0_36 = arith.constant 0 : index
      %49 = vector.load %arg10[%c0_35, %c0_36] : memref<8x512xf32, #tpu.memory_space<vmem>>, vector<8x512xf32>
      tpu.vector_store %arg10[%c0_35, %c0_36], %48 {strides = array<i32>} : memref<8x512xf32, #tpu.memory_space<vmem>>, vector<8x512xf32>,
    } else {
    }
    %c0 = arith.constant 0 : index
    %c0_1 = arith.constant 0 : index
    %c0_2 = arith.constant 0 : index
    %3 = vector.load %arg6[%c0, %c0_1, %c0_2] : memref<1x512x256xi8, #tpu.memory_space<vmem>>, vector<1x512x256xi8>
    %4 = vector.shape_cast %3 : vector<1x512x256xi8> to vector<512x256xi8>
    %5 = arith.sitofp %4 : vector<512x256xi8> to vector<512x256xf32>
    %6 = arith.truncf %5 : vector<512x256xf32> to vector<512x256xbf16>
    %c3_i32 = arith.constant 3 : i32
    %7 = arith.addi %c3_i32, %arg1 : i32
    %c0_3 = arith.constant 0 : index
    %8 = arith.index_cast %7 : i32 to index
    %c0_4 = arith.constant 0 : index
    %9 = vector.load %arg5[%c0_3, %8, %c0_4] : memref<1x8x512xf32, #tpu.memory_space<vmem>>, vector<1x1x256xf32>
    %10 = vector.shape_cast %9 : vector<1x1x256xf32> to vector<1x256xf32>
    %c0_5 = arith.constant 0 : index
    %c0_6 = arith.constant 0 : index
    %11 = vector.load %arg9[%c0_5, %c0_6] : memref<8x512xbf16, #tpu.memory_space<vmem>>, vector<8x512xbf16>
    %cst = arith.constant dense<0.000000e+00> : vector<8x256xf32>
    %12 = tpu.matmul %11, %6, %cst {dimension_numbers = #tpu.dot_dimension_numbers<[1], [0], [0], [1], [0, 0, 1, 1], [], []>} : vector<8x512xbf16>, vector<512x256xbf16>, vector<8x256xf32> -> vector<8x256xf32>
    %13 = vector.broadcast %10 : vector<1x256xf32> to vector<8x256xf32>
    %14 = arith.addf %12, %13 : vector<8x256xf32>
    %cst_7 = arith.constant 0.000000e+00 : f32
    %15 = vector.broadcast %cst_7 : f32 to vector<8x256xf32>
    %16 = arith.maximumf %14, %15 : vector<8x256xf32>
    %c0_8 = arith.constant 0 : index
    %c0_9 = arith.constant 0 : index
    %c0_10 = arith.constant 0 : index
    %17 = vector.load %arg7[%c0_8, %c0_9, %c0_10] : memref<1x256x512xi8, #tpu.memory_space<vmem>>, vector<1x256x512xi8>
    %18 = vector.shape_cast %17 : vector<1x256x512xi8> to vector<256x512xi8>
    %19 = arith.sitofp %18 : vector<256x512xi8> to vector<256x512xf32>
    %20 = arith.truncf %19 : vector<256x512xf32> to vector<256x512xbf16>
    %c0_11 = arith.constant 0 : index
    %c0_12 = arith.constant 0 : index
    %21 = vector.load %arg10[%c0_11, %c0_12] : memref<8x512xf32, #tpu.memory_space<vmem>>, vector<8x512xf32>
    %22 = arith.truncf %16 : vector<8x256xf32> to vector<8x256xbf16>
    %cst_13 = arith.constant dense<0.000000e+00> : vector<8x512xf32>
    %23 = tpu.matmul %22, %20, %cst_13 {dimension_numbers = #tpu.dot_dimension_numbers<[1], [0], [0], [1], [0, 0, 1, 1], [], []>} : vector<8x256xbf16>, vector<256x512xbf16>, vector<8x512xf32> -> vector<8x512xf32>
    %24 = arith.addf %21, %23 : vector<8x512xf32>
    %c0_14 = arith.constant 0 : index
    %c0_15 = arith.constant 0 : index
    %25 = vector.load %arg10[%c0_14, %c0_15] : memref<8x512xf32, #tpu.memory_space<vmem>>, vector<8x512xf32>
    tpu.vector_store %arg10[%c0_14, %c0_15], %24 {strides = array<i32>} : memref<8x512xf32, #tpu.memory_space<vmem>>, vector<8x512xf32>,
    %c1_i32 = arith.constant 1 : i32
    %26 = arith.cmpi eq, %arg1, %c1_i32 : i32
    %27 = arith.extui %26 : i1 to i32
    %c0_i32_16 = arith.constant 0 : i32
    %28 = arith.cmpi ne, %27, %c0_i32_16 : i32
    scf.if %28 {
      %c0_17 = arith.constant 0 : index
      %c1 = arith.constant 1 : index
      %c0_18 = arith.constant 0 : index
      %29 = vector.load %arg5[%c0_17, %c1, %c0_18] : memref<1x8x512xf32, #tpu.memory_space<vmem>>, vector<1x1x512xf32>
      %30 = vector.shape_cast %29 : vector<1x1x512xf32> to vector<1x512xf32>
      %c0_19 = arith.constant 0 : index
      %c0_20 = arith.constant 0 : index
      %31 = vector.load %arg10[%c0_19, %c0_20] : memref<8x512xf32, #tpu.memory_space<vmem>>, vector<8x512xf32>
      %32 = vector.broadcast %30 : vector<1x512xf32> to vector<8x512xf32>
      %33 = arith.addf %31, %32 : vector<8x512xf32>
      %cst_21 = arith.constant 0.000000e+00 : f32
      %34 = vector.broadcast %cst_21 : f32 to vector<8x512xf32>
      %35 = arith.maximumf %33, %34 : vector<8x512xf32>
      %36 = arith.truncf %35 : vector<8x512xf32> to vector<8x512xbf16>
      %c0_22 = arith.constant 0 : index
      %c32 = arith.constant 32 : index
      %c0_23 = arith.constant 0 : index
      %37 = vector.load %arg4[%c0_22, %c32, %c0_23] : memref<1x48x512xbf16, #tpu.memory_space<vmem>>, vector<1x16x512xbf16>
      %38 = vector.shape_cast %37 : vector<1x16x512xbf16> to vector<16x512xbf16>
      %c0_24 = arith.constant 0 : index
      %c2 = arith.constant 2 : index
      %c0_25 = arith.constant 0 : index
      %39 = vector.load %arg5[%c0_24, %c2, %c0_25] : memref<1x8x512xf32, #tpu.memory_space<vmem>>, vector<1x1x16xf32>
      %40 = vector.shape_cast %39 : vector<1x1x16xf32> to vector<1x16xf32>
      %cst_26 = arith.constant dense<0.000000e+00> : vector<8x16xf32>
      %41 = tpu.matmul %36, %38, %cst_26 {dimension_numbers = #tpu.dot_dimension_numbers<[1], [1], [0], [0], [0, 0, 1, 0], [], []>} : vector<8x512xbf16>, vector<16x512xbf16>, vector<8x16xf32> -> vector<8x16xf32>
      %42 = vector.broadcast %40 : vector<1x16xf32> to vector<8x16xf32>
      %43 = arith.addf %41, %42 : vector<8x16xf32>
      %c0_27 = arith.constant 0 : index
      %c0_28 = arith.constant 0 : index
      %c0_29 = arith.constant 0 : index
      %44 = vector.load %arg8[%c0_27, %c0_28, %c0_29] : memref<1x8x16xf32, #tpu.memory_space<vmem>>, vector<1x8x16xf32>
      %45 = vector.shape_cast %44 : vector<1x8x16xf32> to vector<8x16xf32>
      %46 = vector.shape_cast %43 : vector<8x16xf32> to vector<1x8x16xf32>
      tpu.vector_store %arg8[%c0_27, %c0_28, %c0_29], %46 {strides = array<i32>} : memref<1x8x16xf32, #tpu.memory_space<vmem>>, vector<1x8x16xf32>,
    } else {
    }
    return
  }
  func.func @transform_0(%arg0: i32, %arg1: i32) -> (i32, i32) {
    %c0_i32 = arith.constant 0 : i32
    %c0_i32_0 = arith.constant 0 : i32
    %c0_i32_1 = arith.constant 0 : i32
    return %c0_i32, %c0_i32_0 : i32, i32
  }
  func.func @transform_1(%arg0: i32, %arg1: i32) -> (i32, i32) {
    %c0_i32 = arith.constant 0 : i32
    %c0_i32_0 = arith.constant 0 : i32
    %c0_i32_1 = arith.constant 0 : i32
    return %c0_i32, %c0_i32_0 : i32, i32
  }
  func.func @transform_2(%arg0: i32, %arg1: i32) -> (i32, i32, i32) {
    %c0_i32 = arith.constant 0 : i32
    %c0_i32_0 = arith.constant 0 : i32
    %c0_i32_1 = arith.constant 0 : i32
    return %arg0, %c0_i32, %c0_i32_0 : i32, i32, i32
  }
  func.func @transform_3(%arg0: i32, %arg1: i32) -> (i32, i32, i32) {
    %c0_i32 = arith.constant 0 : i32
    %c0_i32_0 = arith.constant 0 : i32
    %c0_i32_1 = arith.constant 0 : i32
    return %arg0, %c0_i32, %c0_i32_0 : i32, i32, i32
  }
  func.func @transform_4(%arg0: i32, %arg1: i32) -> (i32, i32, i32) {
    %c0_i32 = arith.constant 0 : i32
    %c0_i32_0 = arith.constant 0 : i32
    return %arg0, %c0_i32, %arg1 : i32, i32, i32
  }
  func.func @transform_5(%arg0: i32, %arg1: i32) -> (i32, i32, i32) {
    %c0_i32 = arith.constant 0 : i32
    %c0_i32_0 = arith.constant 0 : i32
    return %arg0, %arg1, %c0_i32 : i32, i32, i32
  }
  func.func @transform_6(%arg0: i32, %arg1: i32) -> (i32, i32, i32) {
    %c0_i32 = arith.constant 0 : i32
    %c0_i32_0 = arith.constant 0 : i32
    %c0_i32_1 = arith.constant 0 : i32
    return %arg0, %c0_i32, %c0_i32_0 : i32, i32, i32
  }
}

</mosaic_0001>

<bundles_post_ra>
// kernel: critic_forward.1
= control target key start
LH: loop header
LB: loop body
LE: loop exit
PB: predicated region body
PF: predicated region fallthrough
CT: control target
= control target key end

     0   :  { %s2501_s0 = inlined_call_operand.hbm [shape: f32[8,8], index: 0, kind: input, shape index: {}]   ;;  %s2502_s1 = inlined_call_operand.hbm [shape: f32[8,8], index: 1, kind: input, shape index: {}]   ;;  %s2503_s2 = inlined_call_operand.hbm [shape: bf16[2,48,512], index: 2, kind: input, shape index: {}]   ;;  %s2504_s3 = inlined_call_operand.hbm [shape: f32[2,8,512], index: 3, kind: input, shape index: {}]   ;;  %s2505_s4 = inlined_call_operand.hbm [shape: s8[2,512,512], index: 4, kind: input, shape index: {}]   ;;  %s2506_s5 = inlined_call_operand.hbm [shape: s8[2,512,512], index: 5, kind: input, shape index: {}]   ;;  %s2507_s6 = inlined_call_operand.vmem [shape: f32[2,8,16], index: 6, kind: output, shape index: {}]  }
   0x1   :  { %2528 = sst [smem:[#allocation21_spill]] %s2501_s0 }
   0x2   :  { %2529 = sst [smem:[#allocation22_spill]] %s2503_s2 }
   0x3   :  { %2530 = sst [smem:[#allocation23_spill]] %s2504_s3 }
   0x4   :  { %2531 = sst [smem:[#allocation24_spill]] %s2505_s4 }
   0x5   :  { %2532 = sst [smem:[#allocation25_spill]] %s2507_s6 }
   0x6   :  { %11 = vsyncpa [#allocation5], 0 }
   0x7   :  { %12 = vsyncpa [#allocation7], 0  ;;  %s1986_s21 = smov 0   ;;  %s1988_s22 = smov 0  }
   0x8   :  { %s1990_s23 = smov 0   ;;  %s1992_s24 = smov 0  }
   0x9   :  { %s1994_s25 = smov 0   ;;  %s1996_s26 = smov 0  }
   0xa   :  { %s1998_s27 = smov 0   ;;  %s2000_s28 = smov 0  }
   0xb   :  { %s2002_s29 = smov 0   ;;  %s2004_s30 = smov 0  }
   0xc   :  { %s2006_s7 = smov 0  }
   0xd LB: > { %2533 = sst [smem:[#allocation16_spill]] %s1921_s27  ;;  %s2508_s8 = sadd.s32 4294967295, %s1937_s7   ;;  %s1937_s7 = sphi %s2006_s7, %s18_s7   ;;  %s1933_s30 = sphi %s2004_s30, %s2585_s30   ;;  %s1929_s29 = sphi %s2002_s29, %s2584_s29   ;;  %s1925_s28 = sphi %s2000_s28, %s2583_s28   ;;  %s1921_s27 = sphi %s1998_s27, %s2582_s27   ;;  %s1917_s26 = sphi %s1996_s26, %s2581_s26   ;;  %s1913_s25 = sphi %s1994_s25, %s2580_s25   ;;  %s1909_s24 = sphi %s1992_s24, %s2579_s24   ;;  %s1905_s23 = sphi %s1990_s23, %s2578_s23   ;;  %s1901_s22 = sphi %s1988_s22, %s2577_s22   ;;  %s1897_s21 = sphi %s1986_s21, %s2576_s21  }
   0xe   : > { %2534 = sst [smem:[#allocation17_spill]] %s1925_s28  ;;  %p86_p0 = scmp.ne.s32.totalorder %s1917_s26, %s1913_s25 }
   0xf   : > { %p87_p1 = scmp.eq.s32.totalorder %s1937_s7, 0  ;;  %p92_p2 = scmp.ne.s32.totalorder %s1913_s25, %s1909_s24 }
  0x10   : > { %p2045_p3 = scmp.eq.s32.totalorder %s2508_s8, 0  ;;  %p140_p6 = scmp.ne.s32.totalorder %s1905_s23, %s1901_s22 }
  0x11   : > { %p2049_p4 = por %p87_p1, %p86_p0  ;;  %p146_p7 = scmp.ne.s32.totalorder %s1901_s22, %s1897_s21 }
  0x12   : > { %s2535_s10 = scalar_select %p2045_p3, 1, 0 }
  0x13   : > { %p2056_p5 = por %p2045_p3, %p92_p2  ;;  %p1431_p8 = scmp.ge.s32.totalorder %s1937_s7, 1 }
  0x14   : > { %p142_p9 = por %p140_p6, %p87_p1  ;;  %p211_p10 = scmp.lt.s32.totalorder %s1937_s7, 5 }
  0x15   : > { %s2537_s13 = scalar_select %p2056_p5, 1, 0 }
  0x16   : > { %p2067_p11 = por %p146_p7, %p2045_p3  ;;  %p2071_p12 = pnand %p1431_p8, %p211_p10 }
  0x17   : > { %s1939_s16 = smov [#allocation4]   ;;  %p1542_p0 = scmp.lt.s32.totalorder %s1937_s7, 4 }
  0x18   : > { %s2538_s14 = scalar_select %p2067_p11, 1, 0 }
  0x19   : > { %s2539_s15 = scalar_select %p2071_p12, 1, 0 }
  0x1a   : > { %s224_s17 = sshll.u32 %s1939_s16, 4  ;;  %p1520_p13 = pneg %p2071_p12  ;;  %s225_s17 = int_to_ptr.vmem [resolvable:$true] %s224_s17 }
  0x1b   : > { %p2086_p1 = pnand %p1542_p0, %p2049_p4  ;;  %p2090_p6 = pnand %p1542_p0, %p142_p9 }
  0x1c   : > { %p2080_p2 = pnand %p1520_p13, %p2045_p3  ;;  %s2543_s0 = sld [smem:[#allocation21_spill]] }
  0x1d   : > { %s2541_s19 = scalar_select %p2086_p1, 1, 0 }
  0x1e   : > { %s2540_s18 = scalar_select %p2080_p2, 1, 0 }
  0x1f   : > { %s2542_s20 = scalar_select %p2090_p6, 1, 0 }
  0x20   : > { %p2518_p8 = pneg %p2080_p2 }
  0x22   : > { %s1659_s8 = scalar_lea.hbm %s2543_s0, 128 }
  0x23   : > { %p1660_p7 = scmp.ne.s32.totalorder %s2543_s0, %s1659_s8  ;;  %p1666_p9 = scmp.lt.u32.totalorder %s1659_s8, %s2543_s0 }
  0x25   : > { %p1662_p4 = pnand %p2518_p8, %p1660_p7 }
  0x27   : > { %p1663_p10 = pneg %p1662_p4 }
  0x29   : > { %p1668_p13 = pnand %p1666_p9, %p1663_p10 }
  0x2b   : > { %1671 = shalt.err (!%p1668_p13)
}
  0x2c   : > { %s1672_s21 = scalar_lea.vmem %s225_s17, 128  ;;  %p1680_p3 = scmp.lt.s32.totalorder %s225_s17, %s225_s17 }
  0x2d   : > { %p1673_p0 = scmp.ne.s32.totalorder %s225_s17, %s1672_s21  ;;  %p1681_p12 = scmp.lt.s32.totalorder %s1672_s21, %s1672_s21 }
  0x2f   : > { %p1675_p11 = pnand %p1673_p0, %p2518_p8  ;;  %p1682_p6 = por %p1681_p12, %p1680_p3 }
  0x31   : > { %p1676_p5 = pneg %p1675_p11 }
  0x33   : > { %p1683_p1 = pnand %p1682_p6, %p1676_p5 }
  0x35   : > { %1686 = shalt.err (!%p1683_p1)
}
  0x36   : > { %1523 = dma.hbm_to_vmem [thread:$0]  (!%p2080_p2), %s2543_s0, 128, %s225_s17, [#allocation5]  }
  0x37   : > { %s246_s27 = sand.u32 1, %s1937_s7   ;;  %s248_s8 = sand.u32 1, %s1917_s26  }
  0x38   : > { %s1501_s24 = smul.u32 96, %s248_s8  ;;  %s2544_s2 = sld [smem:[#allocation22_spill]] }
  0x39   : > { %s1502_s16 = smul.u32 1536, %s1933_s30  ;;  %s2127_s28 = sshll.u32 %s248_s8, 5 }
  0x3a   : > { %s250_s9 = scalar_lea.vmem [#allocation8], %s1501_s24  ;;  %s2129_s17 = scalar_lea.sflag [#allocation5], %s246_s27 }
  0x3b   : > { %s257_s12 = sshll.u32 %s250_s9, 4  ;;  %p2545_p5 = scmp.ne.s32.totalorder %s2541_s19, 0  ;;  %s2125_s12 = int_to_ptr.vmem [resolvable:$true] %s257_s12 }
  0x3d   : > { %p1689_p11 = pneg %p2545_p5 }
  0x3e   : > { %s2123_s6 = scalar_lea.hbm %s2544_s2, %s1502_s16  ;;  %s1692_s21 = scalar_lea.hbm %s2544_s2, 3072 }
  0x3f   : > { %s1687_s0 = scalar_lea.hbm %s2123_s6, 1536  ;;  %p1693_p6 = scmp.lt.u32.totalorder %s2123_s6, %s2544_s2 }
  0x40   : > { %p1688_p3 = scmp.ne.s32.totalorder %s2123_s6, %s1687_s0  ;;  %p1694_p7 = scmp.lt.u32.totalorder %s1692_s21, %s1687_s0 }
  0x41   : > { %p1696_p10 = scmp.lt.u32.totalorder %s1687_s0, %s2123_s6 }
  0x42   : > { %p1690_p12 = pnand %p1689_p11, %p1688_p3  ;;  %p1695_p4 = por %p1694_p7, %p1693_p6 }
  0x44   : > { %p1691_p1 = pneg %p1690_p12  ;;  %p1697_p9 = por %p1696_p10, %p1695_p4 }
  0x46   : > { %p1698_p13 = pnand %p1697_p9, %p1691_p1 }
  0x48   : > { %1701 = shalt.err (!%p1698_p13)
}
  0x49   : > { %s1702_s27 = scalar_lea.vmem %s2125_s12, 1536  ;;  %s1940_s8 = smov [#allocation8]  }
  0x4a   : > { %p1703_p0 = scmp.ne.s32.totalorder %s2125_s12, %s1702_s27  ;;  %s1707_s16 = sshll.u32 %s1940_s8, 4  ;;  %s1708_s16 = int_to_ptr.vmem [resolvable:$false] %s1707_s16 }
  0x4b   : > { %s1709_s11 = scalar_lea.vmem %s1708_s16, 3072  ;;  %p1710_p8 = scmp.lt.s32.totalorder %s2125_s12, %s1708_s16 }
  0x4c   : > { %p1705_p3 = pnand %p1703_p0, %p1689_p11  ;;  %p1711_p6 = scmp.lt.s32.totalorder %s1709_s11, %s1702_s27 }
  0x4e   : > { %p1706_p12 = pneg %p1705_p3  ;;  %p1712_p7 = por %p1711_p6, %p1710_p8 }
  0x50   : > { %p1713_p4 = pnand %p1712_p7, %p1706_p12 }
  0x52   : > { %1716 = shalt.err (!%p1713_p4)
}
  0x53   : > { %s2519_s0 = smov 256   ;;  %s2522_s21 = smov 16  }
  0x54   : > { %1530 = dma.hbm_to_vmem [thread:$0]  (!%p2545_p5), %s2123_s6, 1536, %s2125_s12, %s2129_s17, %s2519_s0, %s2519_s0, %s2522_s21  }
  0x55   : > { %s1488_s24 = sshll.u32 %s1933_s30, 9  ;;  %s2546_s3 = sld [smem:[#allocation23_spill]] }
  0x56   : > { %s271_s16 = scalar_lea.vmem [#allocation9], %s2127_s28 }
  0x57   : > { %s279_s11 = sshll.u32 %s271_s16, 4  ;;  %s280_s11 = int_to_ptr.vmem [resolvable:$true] %s279_s11 }
  0x5b   : > { %s2164_s8 = scalar_lea.hbm %s2546_s3, %s1488_s24  ;;  %s1722_s0 = scalar_lea.hbm %s2546_s3, 1024 }
  0x5c   : > { %s1717_s2 = scalar_lea.hbm %s2164_s8, 512  ;;  %p1723_p9 = scmp.lt.u32.totalorder %s2164_s8, %s2546_s3 }
  0x5d   : > { %p1718_p8 = scmp.ne.s32.totalorder %s2164_s8, %s1717_s2  ;;  %p1724_p13 = scmp.lt.u32.totalorder %s1722_s0, %s1717_s2 }
  0x5e   : > { %p1726_p3 = scmp.lt.u32.totalorder %s1717_s2, %s2164_s8 }
  0x5f   : > { %p1720_p1 = pnand %p1718_p8, %p1689_p11  ;;  %p1725_p0 = por %p1724_p13, %p1723_p9 }
  0x61   : > { %p1721_p10 = pneg %p1720_p1  ;;  %p1727_p12 = por %p1726_p3, %p1725_p0 }
  0x63   : > { %p1728_p6 = pnand %p1727_p12, %p1721_p10 }
  0x65   : > { %1731 = shalt.err (!%p1728_p6)
}
  0x66   : > { %s1732_s28 = scalar_lea.vmem %s280_s11, 512  ;;  %s1943_s27 = smov [#allocation9]  }
  0x67   : > { %p1733_p7 = scmp.ne.s32.totalorder %s280_s11, %s1732_s28  ;;  %s1737_s16 = sshll.u32 %s1943_s27, 4  ;;  %s1738_s16 = int_to_ptr.vmem [resolvable:$false] %s1737_s16 }
  0x68   : > { %s1739_s6 = scalar_lea.vmem %s1738_s16, 1024  ;;  %p1740_p1 = scmp.lt.s32.totalorder %s280_s11, %s1738_s16 }
  0x69   : > { %p1735_p4 = pnand %p1733_p7, %p1689_p11  ;;  %p1741_p2 = scmp.lt.s32.totalorder %s1739_s6, %s1732_s28 }
  0x6b   : > { %p1736_p8 = pneg %p1735_p4  ;;  %p1742_p9 = por %p1741_p2, %p1740_p1 }
  0x6d   : > { %p1743_p13 = pnand %p1742_p9, %p1736_p8 }
  0x6f   : > { %1746 = shalt.err (!%p1743_p13)
}
  0x70   : > { %1533 = dma.hbm_to_vmem [thread:$0]  (!%p2545_p5), %s2164_s8, 512, %s280_s11, %s2129_s17  }
  0x71   : > { %s288_s2 = sand.u32 1, %s1905_s23   ;;  %s27_s0 = sadd.s32 1, %s1929_s29 }
  0x72   : > { %s2189_s12 = sshll.u32 %s288_s2, 8  ;;  %p28_p2 = scmp.ge.s32.totalorder %s27_s0, 2 }
  0x73   : > { %s1440_s9 = sshll.u32 %s1929_s29, 1  ;;  %s2523_s19 = sshll.u32 %s1933_s30, 6 }
  0x74   : > { %s2587_s0 = smov (%p28_p2, %s27_s0), 0  ;;  %s2548_s24 = sadd.s32 1, %s1933_s30 }
  0x75   : > { %2547 = sst [smem:[#allocation18_spill]] %s2587_s0  ;;  %s2589_s24 = smov (!%p28_p2, %s2548_s24), %s1933_s30 }
  0x76   : > { %s129_s28 = ssub.s32 %s1929_s29, %s2587_s0  ;;  %s296_s8 = sadd.s32 %s2523_s19, %s1440_s9 }
  0x77   : > { %p32_p5 = scmp.ge.s32.totalorder %s2589_s24, 2  ;;  %s1442_s11 = sshll.u32 %s296_s8, 7 }
  0x78   : > { %s2549_s4 = sld [smem:[#allocation24_spill]]  ;;  %s290_s2 = scalar_lea.vmem [#allocation10], %s2189_s12 }
  0x79   : > { %s299_s21 = sshll.u32 %s290_s2, 4  ;;  %s2591_s24 = smov (%p32_p5, %s2589_s24), 0  ;;  %s2210_s21 = int_to_ptr.vmem [resolvable:$true] %s299_s21 }
  0x7a   : > { %2550 = sst [smem:[#allocation19_spill]] %s2591_s24  ;;  %s76_s9 = ssub.s32 %s1933_s30, %s2591_s24 }
  0x7b   : > { %p77_p11 = scmp.eq.s32.totalorder %s76_s9, 0  ;;  %s130_s8 = sor.u32 %s129_s28, %s76_s9 }
  0x7c   : > { %p131_p10 = scmp.eq.s32.totalorder %s130_s8, 0  ;;  %s1944_s27 = smov [#allocation6]  }
  0x7d   : > { %s2214_s16 = sshll.u32 %s1944_s27, 4  ;;  %s2553_s3 = sadd.s32 1, %s1905_s23  ;;  %s236_s16 = int_to_ptr.vmem [resolvable:$true] %s2214_s16 }
  0x7e   : > { %s2205_s6 = scalar_lea.hbm %s2549_s4, %s1442_s11  ;;  %s2551_s11 = sadd.s32 1, %s1917_s26 }
  0x7f   : > { %s2219_s19 = scalar_select %p77_p11, %s1917_s26, %s2551_s11  }
  0x80   : > { %s2224_s0 = scalar_select %p131_p10, %s1905_s23, %s2553_s3  }
  0x81   : > { %2552 = sst [smem:[#allocation20_spill]] %s2219_s19  ;;  %s1747_s2 = scalar_lea.hbm %s2205_s6, 4096 }
  0x82   : > { %p1748_p0 = scmp.ne.s32.totalorder %s2205_s6, %s1747_s2  ;;  %p2554_p3 = scmp.ne.s32.totalorder %s2542_s20, 0 }
  0x83   : > { %s1752_s9 = scalar_lea.hbm %s2549_s4, 16384  ;;  %p1753_p4 = scmp.lt.u32.totalorder %s2205_s6, %s2549_s4 }
  0x84   : > { %p2526_p12 = pneg %p2554_p3  ;;  %p1754_p8 = scmp.lt.u32.totalorder %s1752_s9, %s1747_s2 }
  0x85   : > { %p1756_p9 = scmp.lt.u32.totalorder %s1747_s2, %s2205_s6 }
  0x86   : > { %p1750_p6 = pnand %p2526_p12, %p1748_p0  ;;  %p1755_p1 = por %p1754_p8, %p1753_p4 }
  0x88   : > { %p1751_p7 = pneg %p1750_p6  ;;  %p1757_p13 = por %p1756_p9, %p1755_p1 }
  0x8a   : > { %p1758_p2 = pnand %p1757_p13, %p1751_p7 }
  0x8c   : > { %1761 = shalt.err (!%p1758_p2)
}
  0x8d   : > { %s1762_s3 = scalar_lea.vmem %s2210_s21, 4096  ;;  %s1945_s24 = smov [#allocation10]  }
  0x8e   : > { %p1763_p5 = scmp.ne.s32.totalorder %s2210_s21, %s1762_s3  ;;  %s1767_s11 = sshll.u32 %s1945_s24, 4  ;;  %s1768_s11 = int_to_ptr.vmem [resolvable:$false] %s1767_s11 }
  0x8f   : > { %s1769_s28 = scalar_lea.vmem %s1768_s11, 8192  ;;  %p1770_p0 = scmp.lt.s32.totalorder %s2210_s21, %s1768_s11 }
  0x90   : > { %p1765_p11 = pnand %p1763_p5, %p2526_p12  ;;  %p1771_p6 = scmp.lt.s32.totalorder %s1769_s28, %s1762_s3 }
  0x92   : > { %p1766_p10 = pneg %p1765_p11  ;;  %p1772_p4 = por %p1771_p6, %p1770_p0 }
  0x94   : > { %p1773_p8 = pnand %p1772_p4, %p1766_p10 }
  0x96   : > { %1776 = shalt.err (!%p1773_p8)
}
  0x97   : > { %s1946_s2 = smov 512   ;;  %s2555_s9 = smov 16  }
  0x98   : > { %s2556_s8 = smov 256   ;;  %s1777_s3 = scalar_lea.hbm %s2502_s1, 128 }
  0x99   : > { %1536 = dma.hbm_to_vmem [thread:$0]  (!%p2554_p3), %s2205_s6, 4096, %s2210_s21, %s2129_s17, %s1946_s2, %s2556_s8, %s2555_s9  }
  0x9a   : > { %p1778_p7 = scmp.ne.s32.totalorder %s2502_s1, %s1777_s3  ;;  %p2557_p1 = scmp.ne.s32.totalorder %s2540_s18, 0 }
  0x9b   : > { %p1784_p5 = scmp.lt.u32.totalorder %s1777_s3, %s2502_s1 }
  0x9c   : > { %p2558_p9 = pneg %p2557_p1 }
  0x9e   : > { %p1780_p13 = pnand %p1778_p7, %p2558_p9 }
  0xa0   : > { %p1781_p2 = pneg %p1780_p13 }
  0xa2   : > { %p1786_p11 = pnand %p1784_p5, %p1781_p2 }
  0xa4   : > { %1789 = shalt.err (!%p1786_p11)
}
  0xa5   : > { %s1790_s21 = scalar_lea.vmem %s236_s16, 128  ;;  %p2559_p0 = pmov %p2558_p9 }
  0xa6   : > { %p1791_p10 = scmp.ne.s32.totalorder %s236_s16, %s1790_s21  ;;  %p1798_p8 = scmp.lt.s32.totalorder %s236_s16, %s236_s16 }
  0xa7   : > { %p1799_p12 = scmp.lt.s32.totalorder %s1790_s21, %s1790_s21 }
  0xa8   : > { %p1793_p6 = pnand %p1791_p10, %p2559_p0 }
  0xa9   : > { %p1800_p3 = por %p1799_p12, %p1798_p8 }
  0xaa   : > { %p1794_p4 = pneg %p1793_p6 }
  0xac   : > { %p1801_p7 = pnand %p1800_p3, %p1794_p4 }
  0xae   : > { %1804 = shalt.err (!%p1801_p7)
}
  0xaf   : > { %1526 = dma.hbm_to_vmem [thread:$0]  (!%p2557_p1), %s2502_s1, 128, %s236_s16, [#allocation7]  }
  0xb0   : > { %s1489_s4 = sshll.u32 %s1929_s29, 5  ;;  %s313_s19 = scalar_lea.vmem [#allocation11], %s2189_s12 }
  0xb1   : > { %s323_s8 = sshll.u32 %s313_s19, 4  ;;  %s2560_s27 = sshll.u32 %s1933_s30, 6  ;;  %s2280_s8 = int_to_ptr.vmem [resolvable:$true] %s323_s8 }
  0xb2   : > { %s320_s24 = sadd.s32 %s1489_s4, %s2560_s27  ;;  %p2561_p12 = scmp.ne.s32.totalorder %s2542_s20, 0 }
  0xb3   : > { %s1447_s3 = sshll.u32 %s320_s24, 7  ;;  %s1810_s6 = scalar_lea.hbm %s2506_s5, 16384 }
  0xb4   : > { %s2285_s18 = scalar_lea.hbm %s2506_s5, %s1447_s3  ;;  %p2562_p1 = pneg %p2561_p12 }
  0xb5   : > { %s1805_s21 = scalar_lea.hbm %s2285_s18, 4096  ;;  %p1811_p2 = scmp.lt.u32.totalorder %s2285_s18, %s2506_s5 }
  0xb6   : > { %p1806_p3 = scmp.ne.s32.totalorder %s2285_s18, %s1805_s21  ;;  %p1812_p5 = scmp.lt.u32.totalorder %s1810_s6, %s1805_s21 }
  0xb7   : > { %p1814_p10 = scmp.lt.u32.totalorder %s1805_s21, %s2285_s18 }
  0xb8   : > { %p1808_p9 = pnand %p1806_p3, %p2562_p1  ;;  %p1813_p11 = por %p1812_p5, %p1811_p2 }
  0xba   : > { %p1809_p13 = pneg %p1808_p9  ;;  %p1815_p0 = por %p1814_p10, %p1813_p11 }
  0xbc   : > { %p1816_p6 = pnand %p1815_p0, %p1809_p13 }
  0xbe   : > { %1819 = shalt.err (!%p1816_p6)
}
  0xbf   : > { %s1820_s19 = scalar_lea.vmem %s2280_s8, 4096  ;;  %p2563_p8 = pmov %p2562_p1 }
  0xc0   : > { %p1821_p4 = scmp.ne.s32.totalorder %s2280_s8, %s1820_s19  ;;  %s1947_s27 = smov [#allocation11]  }
  0xc1   : > { %s1825_s24 = sshll.u32 %s1947_s27, 4  ;;  %s1826_s24 = int_to_ptr.vmem [resolvable:$false] %s1825_s24 }
  0xc2   : > { %p1823_p7 = pnand %p1821_p4, %p2563_p8  ;;  %s1827_s3 = scalar_lea.vmem %s1826_s24, 8192 }
  0xc3   : > { %p1828_p1 = scmp.lt.s32.totalorder %s2280_s8, %s1826_s24  ;;  %p1829_p9 = scmp.lt.s32.totalorder %s1827_s3, %s1820_s19 }
  0xc4   : > { %p1824_p3 = pneg %p1823_p7 }
  0xc5   : > { %p1830_p2 = por %p1829_p9, %p1828_p1 }
  0xc7   : > { %p1831_p5 = pnand %p1830_p2, %p1824_p3 }
  0xc9   : > { %1834 = shalt.err (!%p1831_p5)
}
  0xca   : > { %s1948_s11 = smov 32   ;;  %p2564_p13 = scmp.ne.s32.totalorder %s2539_s15, 0 }
  0xcb   : > { %1539 = dma.hbm_to_vmem [thread:$0]  (!%p2561_p12), %s2285_s18, 4096, %s2280_s8, %s2129_s17, %s1946_s2, %s1946_s2, %s1948_s11  }
  0xcc   : > { %335 = sbr.rel (%p2564_p13) target bundleno = 1329 (0x531), region = 44  ;;  %p2565_p11 = scmp.ne.s32.totalorder (!%p2564_p13), %s2535_s10, 0 }
  0xd3   : > { %1880 = dma.done.wait (%p2565_p11), [#allocation5], 128  }
  0xd4   : > { %1882 = vsyncadd (%p2565_p11), [#allocation5], 4294967168 }
  0xd5   : > { %1884 = dma.done.wait (%p2565_p11), [#allocation7], 128  }
  0xd6   : > { %1886 = vsyncadd (%p2565_p11), [#allocation7], 4294967168  ;;  %s2566_s20 = sadd.s32 4294967295, %s1937_s7   ;;  %s347_s2 = sand.u32 1, %s1913_s25  }
  0xd7   : > { %s345_s17 = sand.u32 1, %s2566_s20   ;;  %s1503_s15 = smul.u32 96, %s347_s2 }
  0xd8   : > { %s346_s8 = scalar_lea.sflag [#allocation5], %s345_s17  ;;  %p2567_p12 = scmp.ne.s32.totalorder %s2537_s13, 0 }
  0xd9   : > { %s2326_s28 = scalar_lea.vmem [#allocation8], %s1503_s15 }
  0xda   : > { %1888 = dma.done.wait (%p2567_p12), %s346_s8, 2048  }
  0xdb   : > { %1890 = vsyncadd (%p2567_p12), %s346_s8, 4294965248  ;;  %s1451_s18 = sshll.u32 %s347_s2, 5  ;;  %s365_s10 = sand.u32 1, %s1901_s22  }
  0xdc   : > { %s1452_s21 = sshll.u32 %s365_s10, 8  ;;  %s2333_s12 = scalar_lea.vmem [#allocation9], %s1451_s18 }
  0xdd   : > { %s2335_s16 = scalar_lea.vmem [#allocation10], %s1452_s21  ;;  %p2568_p10 = scmp.ne.s32.totalorder %s2538_s14, 0 }
  0xdf   : > { %1892 = dma.done.wait (%p2568_p10), %s346_s8, 8192  }
  0xe0   : > { %1894 = vsyncadd (%p2568_p10), %s346_s8, 4294959104  ;;  %s2569_s6 = sld [smem:[#allocation17_spill]]  ;;  %s2570_s19 = sld [smem:[#allocation25_spill]] }
  0xe1   : > { %s2348_s24 = scalar_lea.vmem [#allocation11], %s1452_s21  ;;  %s2571_s3 = sld [smem:[#allocation16_spill]] }
  0xe6   : > { %p421_p0 = scmp.lt.s32.totalorder %s2569_s6, 1 }
  0xe7   : > { %p1455_p6 = scmp.ne.s32.totalorder %s2571_s3, 0 }
  0xe8   : > { %s2593_s6 = smov (!%p421_p0, %s2569_s6), 1  ;;  %v436_v0 = vld [vmem:[%s2326_s28 + $0x20] sm:$0xff] (!%p1455_p6)  ;;  %vm453_vm0 = vcmask (!%p1455_p6), 1043456   ;;  %v437_v1 = vld [vmem:[%s2326_s28 + $0x28] sm:$0xff] (!%p1455_p6)  ;;  %v432_v2 = vld [vmem:[#allocation6] sm:$0xff] (!%p1455_p6)  ;;  %v1949_v7 = vmov (!%p1455_p6), 0   ;;  %v656_v22 = vlaneseq (!%p1455_p6) }
  0xe9   : > { %s1454_s13 = sshll.u32 %s2593_s6, 3  ;;  %429 = sbr.rel (%p1455_p6) target bundleno = 469 (0x1d5), region = 72  ;;  %v1457_v3 = vcombine.high (!%p1455_p6), %v436_v0, %v436_v0  ;;  %v1459_v4 = vcombine.high (!%p1455_p6), %v437_v1, %v437_v1  ;;  %v1456_v5 = vcombine.low (!%p1455_p6), %v436_v0, %v436_v0  ;;  %v1458_v6 = vcombine.low (!%p1455_p6), %v437_v1, %v437_v1  ;;  %498 = vmatprep.mubr.bf16.mxu0 (!%p1455_p6), %v1949_v7  ;;  %v434_v8 = vld [vmem:[%s2326_s28] sm:$0xff] (!%p1455_p6)  ;;  %v435_v9 = vld [vmem:[%s2326_s28 + $0x8] sm:$0xff] (!%p1455_p6)  ;;  %v430_v19 = vld [vmem:[#allocation4] sm:$0xff] (!%p1455_p6) }
  0xea   : > { %s2346_s27 = scalar_lea.vmem %s2570_s19, %s1454_s13  ;;  %539 = vmatprep.mubr.bf16.mxu1 (!%p1455_p6), %v1949_v7  ;;  %v1465_v10 = vcombine.high (!%p1455_p6), %v434_v8, %v434_v8  ;;  %v1467_v11 = vcombine.high (!%p1455_p6), %v435_v9, %v435_v9  ;;  %v1464_v12 = vcombine.low (!%p1455_p6), %v434_v8, %v434_v8  ;;  %v433_v15 = vpack.c.bf16 (!%p1455_p6), %v432_v2, %v432_v2  ;;  %v438_v34 = vld [vmem:[%s2333_s12] ss:$8 sm:$0xf] (!%p1455_p6) }
  0xeb   : > { %1460 = vmatprep.subr.msk.bf16.mxu0 (!%p1455_p6), %vm453_vm0, %v1457_v3  ;;  %1462 = vmatprep.subr.msk.bf16.mxu1 (!%p1455_p6), %vm453_vm0, %v1459_v4  ;;  %v455_v13 = vsel (!%p1455_p6), %vm453_vm0, %v1456_v5, 0  ;;  %v461_v14 = vsel (!%p1455_p6), %vm453_vm0, %v1458_v6, 0  ;;  %v1466_v16 = vcombine.low (!%p1455_p6), %v435_v9, %v435_v9  ;;  %vm449_vm1 = vcmask (!%p1455_p6), 64512  }
  0xec   : > { %467 = vmatpush1.bf16.msra.mxu0 (!%p1455_p6), %v455_v13  ;;  %508 = vmatpush1.bf16.msra.mxu1 (!%p1455_p6), %v461_v14  ;;  %v562_v17 = vsel (!%p1455_p6), %vm453_vm0, %v1464_v12, 0  ;;  %v431_v20 = vpack.c.bf16 (!%p1455_p6), %v430_v19, %v430_v19  ;;  %v1950_v21 = vmov (!%p1455_p6), 0.0   ;;  %v657_v23 = vshrl.u32 (!%p1455_p6), %v656_v22, 7 }
  0xed   : > { %1468 = vmatprep.subr.msk.bf16.mxu0 (!%p1455_p6), %vm453_vm0, %v1465_v10  ;;  %1470 = vmatprep.subr.msk.bf16.mxu1 (!%p1455_p6), %vm453_vm0, %v1467_v11  ;;  %v568_v18 = vsel (!%p1455_p6), %vm453_vm0, %v1466_v16, 0  ;;  %702 = vst [vmem:[#allocation3] sm:$0xff] (!%p1455_p6), %v1950_v21  ;;  %703 = vst [vmem:[#allocation3 + $0x8] sm:$0xff] (!%p1455_p6), %v1950_v21 }
  0xee   : > { %704 = vst [vmem:[#allocation3 + $0x10] sm:$0xff] (!%p1455_p6), %v1950_v21  ;;  %705 = vst [vmem:[#allocation3 + $0x18] sm:$0xff] (!%p1455_p6), %v1950_v21  ;;  %v658_v32 = vsub.s32 (!%p1455_p6), 0, %v657_v23  ;;  %v666_v33 = vsub.s32 (!%p1455_p6), 2, %v657_v23  ;;  %v662_v35 = vsub.s32 (!%p1455_p6), 1, %v657_v23  ;;  %v670_v36 = vsub.s32 (!%p1455_p6), 3, %v657_v23 }
  0xef   : > { %1461 = vmatmul.mubr.msk.bf16.vlgmr.msra.gmra.mrb[0].mxu0 (!%p1455_p6), %vm449_vm1, %v433_v15  ;;  %1463 = vmatmul.mubr.msk.bf16.vlgmr.msra.gmra.mrb[0].mxu1 (!%p1455_p6), %vm449_vm1, %v433_v15 }
  0xf0   : > { %574 = vmatpush1.bf16.msra.mxu0 %v562_v17  ;;  %615 = vmatpush1.bf16.msra.mxu1 %v568_v18  ;;  %v659_v37 = vrot.slane %v438_v34, %v658_v32  ;;  %v667_v38 = vrot.slane %v438_v34, %v666_v33  ;;  %v663_v41 = vrot.slane %v438_v34, %v662_v35 }
  0xf1   : > { %605 = vmatprep.mubr.bf16.mxu0 %v1949_v7  ;;  %646 = vmatprep.mubr.bf16.mxu1 %v1949_v7  ;;  %v671_v42 = vrot.slane %v438_v34, %v670_v36 }
  0xf7   : > { %1469 = vmatmul.mubr.msk.bf16.vlgmr.msra.gmra.mrb[4].mxu0 %vm449_vm1, %v431_v20  ;;  %1471 = vmatmul.mubr.msk.bf16.vlgmr.msra.gmra.mrb[4].mxu1 %vm449_vm1, %v431_v20 }
 0x1c2   : > { %v500_v24 = vpop.f32.mrb[0].mxu0  ;;  %v541_v25 = vpop.f32.mrb[0].mxu1 }
 0x1c3   : > { %v502_v26 = vpop.f32.mrb[1].mxu0  ;;  %v543_v27 = vpop.f32.mrb[1].mxu1 }
 0x1c4   : > { %v504_v28 = vpop.f32.mrb[2].mxu0  ;;  %v545_v29 = vpop.f32.mrb[2].mxu1 }
 0x1c5   : > { %v505_v30 = vpop.f32.mrb[3].mxu0  ;;  %v546_v31 = vpop.f32.mrb[3].mxu1 }
 0x1ca   : > { %v607_v39 = vpop.f32.mrb[4].mxu0  ;;  %v648_v40 = vpop.f32.mrb[4].mxu1 }
 0x1cb   : > { %v608_v43 = vadd.f32 %v607_v39, %v500_v24  ;;  %v649_v44 = vadd.f32 %v648_v40, %v541_v25  ;;  %v609_v45 = vpop.f32.mrb[5].mxu0  ;;  %v650_v46 = vpop.f32.mrb[5].mxu1 }
 0x1cc   : > { %v610_v47 = vadd.f32 %v609_v45, %v502_v26  ;;  %v651_v48 = vadd.f32 %v650_v46, %v543_v27  ;;  %v611_v49 = vpop.f32.mrb[6].mxu0  ;;  %v652_v50 = vpop.f32.mrb[6].mxu1 }
 0x1cd   : > { %v676_v51 = vadd.f32 %v659_v37, %v608_v43  ;;  %v678_v52 = vadd.f32 %v667_v38, %v649_v44  ;;  %v612_v53 = vpop.f32.mrb[7].mxu0  ;;  %v653_v54 = vpop.f32.mrb[7].mxu1 }
 0x1ce   : > { %v677_v55 = vadd.f32 %v663_v41, %v610_v47  ;;  %v679_v56 = vadd.f32 %v671_v42, %v651_v48 }
 0x1cf   : > { %v680_v57 = vmax.f32 %v676_v51, 0.0  ;;  %v682_v58 = vmax.f32 %v678_v52, 0.0 }
 0x1d0   : > { %v681_v59 = vmax.f32 %v677_v55, 0.0  ;;  %v683_v60 = vmax.f32 %v679_v56, 0.0 }
 0x1d2   : > { %v1490_v61 = vpack.c.bf16 %v681_v59, %v680_v57  ;;  %v1491_v62 = vpack.c.bf16 %v683_v60, %v682_v58 }
 0x1d4   : > { %700 = vst [vmem:[#allocation2] sm:$0xff] %v1490_v61  ;;  %701 = vst [vmem:[#allocation2 + $0x8] sm:$0xff] %v1491_v62 }
 0x1d5 PF: > { %v707_v63 = vld [vmem:[%s2335_s16 + $0x8] sm:$0xff]  ;;  %v706_v0 = vld [vmem:[%s2335_s16] sm:$0xff]  ;;  %v709_v4 = vld [vmem:[%s2335_s16 + $0x18] sm:$0xff]  ;;  %s2572_s14 = sld [smem:[#allocation16_spill]] }
 0x1d6   : > { %v739_v1 = vunpack.c.l.s8.bf16 %v707_v63  ;;  %v741_v2 = vunpack.c.h.s8.bf16 %v707_v63  ;;  %v738_v3 = vunpack.c.l.s8.bf16 %v706_v0  ;;  %v740_v5 = vunpack.c.h.s8.bf16 %v706_v0  ;;  %v708_v7 = vld [vmem:[%s2335_s16 + $0x10] sm:$0xff]  ;;  %v711_v12 = vld [vmem:[%s2335_s16 + $0x28] sm:$0xff]  ;;  %v710_v15 = vld [vmem:[%s2335_s16 + $0x20] sm:$0xff] }
 0x1d7   : > { %v743_v6 = vunpack.c.l.s8.bf16 %v709_v4  ;;  %v742_v9 = vunpack.c.l.s8.bf16 %v708_v7  ;;  %v745_v10 = vunpack.c.h.s8.bf16 %v709_v4  ;;  %v744_v13 = vunpack.c.h.s8.bf16 %v708_v7  ;;  %v924_v16 = vld [vmem:[%s2348_s24 + $0x8] sm:$0xff]  ;;  %v923_v17 = vld [vmem:[%s2348_s24] sm:$0xff]  ;;  %v713_v20 = vld [vmem:[%s2335_s16 + $0x38] sm:$0xff] }
 0x1d8   : > { %839 = vmatprep.subr.bf16.mxu0 %v739_v1  ;;  %v747_v14 = vunpack.c.l.s8.bf16 %v711_v12  ;;  %v746_v18 = vunpack.c.l.s8.bf16 %v710_v15  ;;  %v749_v19 = vunpack.c.h.s8.bf16 %v711_v12  ;;  %v956_v21 = vunpack.c.l.s8.bf16 %v924_v16  ;;  %v928_v24 = vld [vmem:[%s2348_s24 + $0x28] sm:$0xff]  ;;  %v712_v27 = vld [vmem:[%s2335_s16 + $0x30] sm:$0xff]  ;;  %v927_v30 = vld [vmem:[%s2348_s24 + $0x20] sm:$0xff] }
 0x1d9   : > { %840 = vmatpush1.bf16.msra.mxu0 %v738_v3  ;;  %v960_v22 = vunpack.c.h.s8.bf16 %v924_v16  ;;  %v955_v23 = vunpack.c.l.s8.bf16 %v923_v17  ;;  %v748_v25 = vunpack.c.h.s8.bf16 %v710_v15  ;;  %v751_v26 = vunpack.c.l.s8.bf16 %v713_v20  ;;  %v715_v34 = vld [vmem:[%s2335_s16 + $0x48] sm:$0xff]  ;;  %v714_v39 = vld [vmem:[%s2335_s16 + $0x40] sm:$0xff]  ;;  %v717_v46 = vld [vmem:[%s2335_s16 + $0x58] sm:$0xff] }
 0x1da   : > { %841 = vmatprep.subr.bf16.mxu0 %v741_v2  ;;  %1025 = vmatprep.subr.bf16.mxu1 %v956_v21  ;;  %v959_v28 = vunpack.c.h.s8.bf16 %v923_v17  ;;  %v964_v29 = vunpack.c.l.s8.bf16 %v928_v24  ;;  %v750_v31 = vunpack.c.l.s8.bf16 %v712_v27  ;;  %v753_v32 = vunpack.c.h.s8.bf16 %v713_v20  ;;  %v932_v36 = vld [vmem:[%s2348_s24 + $0x48] sm:$0xff]  ;;  %v931_v42 = vld [vmem:[%s2348_s24 + $0x40] sm:$0xff]  ;;  %v716_v51 = vld [vmem:[%s2335_s16 + $0x50] sm:$0xff] }
 0x1db   : > { %v2368_v8 = vld [vmem:[#allocation2] sm:$0xff]  ;;  %1026 = vmatpush1.bf16.msra.mxu1 %v955_v23  ;;  %v963_v33 = vunpack.c.l.s8.bf16 %v927_v30  ;;  %v968_v35 = vunpack.c.h.s8.bf16 %v928_v24  ;;  %v752_v37 = vunpack.c.h.s8.bf16 %v712_v27  ;;  %v755_v38 = vunpack.c.l.s8.bf16 %v715_v34  ;;  %v936_v48 = vld [vmem:[%s2348_s24 + $0x68] sm:$0xff]  ;;  %v720_v12 = vld [vmem:[%s2335_s16 + $0x70] sm:$0xff]  ;;  %s802_s11 = sadd.s32 3, %s2572_s14  ;;  %p1480_p4 = scmp.ne.s32.totalorder %s2572_s14, 1 }
 0x1dc   : > { %v1477_v11 = vcombine.high %v2368_v8, %v2368_v8  ;;  %1027 = vmatprep.subr.bf16.mxu1 %v960_v22  ;;  %v967_v40 = vunpack.c.h.s8.bf16 %v927_v30  ;;  %v972_v41 = vunpack.c.l.s8.bf16 %v932_v36  ;;  %v754_v43 = vunpack.c.l.s8.bf16 %v714_v39  ;;  %v935_v54 = vld [vmem:[%s2348_s24 + $0x60] sm:$0xff]  ;;  %v719_v58 = vld [vmem:[%s2335_s16 + $0x68] sm:$0xff]  ;;  %s803_s20 = sshra.s32 %s802_s11, 3  ;;  %s806_s17 = sand.u32 7, %s802_s11 }
 0x1dd   : > { %842 = vmatpush1.bf16.msra.mxu0 %v740_v5  ;;  %v757_v44 = vunpack.c.h.s8.bf16 %v715_v34  ;;  %v971_v45 = vunpack.c.l.s8.bf16 %v931_v42  ;;  %v976_v47 = vunpack.c.h.s8.bf16 %v932_v36  ;;  %v756_v49 = vunpack.c.h.s8.bf16 %v714_v39  ;;  %v940_v60 = vld [vmem:[%s2348_s24 + $0x88] sm:$0xff]  ;;  %v718_v63 = vld [vmem:[%s2335_s16 + $0x60] sm:$0xff]  ;;  %v725_v34 = vld [vmem:[%s2335_s16 + $0x98] sm:$0xff]  ;;  %s1492_s2 = sshll.u32 %s803_s20, 5 }
 0x1de   : > { %843 = vmatprep.subr.bf16.mxu0 %v743_v6  ;;  %871 = vmatprep.mubr.bf16.mxu0 %v1477_v11  ;;  %v759_v50 = vunpack.c.l.s8.bf16 %v717_v46  ;;  %v975_v52 = vunpack.c.h.s8.bf16 %v931_v42  ;;  %v980_v53 = vunpack.c.l.s8.bf16 %v936_v48  ;;  %v758_v55 = vunpack.c.l.s8.bf16 %v716_v51  ;;  %v939_v2 = vld [vmem:[%s2348_s24 + $0x80] sm:$0xff]  ;;  %v721_v6 = vld [vmem:[%s2335_s16 + $0x78] sm:$0xff]  ;;  %v948_v21 = vld [vmem:[%s2348_s24 + $0xc8] sm:$0xff]  ;;  %s809_s15 = sadd.s32 %s1492_s2, %s806_s17 }
 0x1df   : > { %1028 = vmatpush1.bf16.msra.mxu1 %v959_v28  ;;  %v761_v56 = vunpack.c.h.s8.bf16 %v717_v46  ;;  %v979_v57 = vunpack.c.l.s8.bf16 %v935_v54  ;;  %v984_v59 = vunpack.c.h.s8.bf16 %v936_v48  ;;  %v760_v61 = vunpack.c.h.s8.bf16 %v716_v51  ;;  %v943_v15 = vld [vmem:[%s2348_s24 + $0xa0] sm:$0xff]  ;;  %s810_s8 = scalar_lea.vmem %s2333_s12, %s809_s15 [#allocation9] }
 0x1e0   : > { %1029 = vmatprep.subr.bf16.mxu1 %v964_v29  ;;  %v763_v62 = vunpack.c.l.s8.bf16 %v719_v58  ;;  %v983_v0 = vunpack.c.h.s8.bf16 %v935_v54  ;;  %v988_v1 = vunpack.c.l.s8.bf16 %v940_v60  ;;  %v762_v3 = vunpack.c.l.s8.bf16 %v718_v63  ;;  %v722_v24 = vld [vmem:[%s2335_s16 + $0x80] sm:$0xff] }
 0x1e1   : > { %844 = vmatpush1.bf16.msra.mxu0 %v742_v9  ;;  %v765_v4 = vunpack.c.h.s8.bf16 %v719_v58  ;;  %v987_v5 = vunpack.c.l.s8.bf16 %v939_v2  ;;  %v992_v7 = vunpack.c.h.s8.bf16 %v940_v60  ;;  %v944_v9 = vld [vmem:[%s2348_s24 + $0xa8] sm:$0xff]  ;;  %v767_v11 = vunpack.c.l.s8.bf16 %v721_v6  ;;  %v947_v28 = vld [vmem:[%s2348_s24 + $0xc0] sm:$0xff] }
 0x1e2   : > { %845 = vmatprep.subr.bf16.mxu0 %v745_v10  ;;  %v764_v10 = vunpack.c.h.s8.bf16 %v718_v63  ;;  %v766_v16 = vunpack.c.l.s8.bf16 %v720_v12  ;;  %v769_v17 = vunpack.c.h.s8.bf16 %v721_v6  ;;  %v1000_v20 = vunpack.c.h.s8.bf16 %v944_v9 }
 0x1e3   : > { %1030 = vmatpush1.bf16.msra.mxu1 %v963_v33  ;;  %v768_v22 = vunpack.c.h.s8.bf16 %v720_v12  ;;  %v1004_v27 = vunpack.c.l.s8.bf16 %v948_v21  ;;  %v1476_v29 = vcombine.low %v2368_v8, %v2368_v8  ;;  %v770_v30 = vunpack.c.l.s8.bf16 %v722_v24 }
 0x1e4   : > { %1031 = vmatprep.subr.bf16.mxu1 %v968_v35  ;;  %v1003_v33 = vunpack.c.l.s8.bf16 %v947_v28  ;;  %v1008_v35 = vunpack.c.h.s8.bf16 %v948_v21  ;;  %v772_v36 = vunpack.c.h.s8.bf16 %v722_v24  ;;  %v775_v8 = vunpack.c.l.s8.bf16 %v725_v34 }
 0x1e5   : > { %846 = vmatpush1.bf16.msra.mxu0 %v744_v13  ;;  %v991_v13 = vunpack.c.h.s8.bf16 %v939_v2  ;;  %v815_v24 = vlaneseq  ;;  %vm1263_vm2 = vcmask (!%p1480_p4), 130048  }
 0x1e6   : > { %847 = vmatprep.subr.bf16.mxu0 %v747_v14  ;;  %v996_v14 = vunpack.c.l.s8.bf16 %v944_v9 }
 0x1e7   : > { %1032 = vmatpush1.bf16.msra.mxu1 %v967_v40  ;;  %v777_v40 = vunpack.c.h.s8.bf16 %v725_v34 }
 0x1e8   : > { %1033 = vmatprep.subr.bf16.mxu1 %v972_v41  ;;  %v727_v41 = vld [vmem:[%s2335_s16 + $0xa8] sm:$0xff] }
 0x1e9   : > { %848 = vmatpush1.bf16.msra.mxu0 %v746_v18  ;;  %v995_v18 = vunpack.c.l.s8.bf16 %v943_v15  ;;  %v781_v46 = vunpack.c.h.s8.bf16 %v727_v41 }
 0x1ea   : > { %849 = vmatprep.subr.bf16.mxu0 %v749_v19  ;;  %v723_v19 = vld [vmem:[%s2335_s16 + $0x88] sm:$0xff] }
 0x1eb   : > { %1034 = vmatpush1.bf16.msra.mxu1 %v971_v45  ;;  %v771_v23 = vunpack.c.l.s8.bf16 %v723_v19 }
 0x1ec   : > { %1035 = vmatprep.subr.bf16.mxu1 %v976_v47  ;;  %v729_v47 = vld [vmem:[%s2335_s16 + $0xb8] sm:$0xff] }
 0x1ed   : > { %850 = vmatpush1.bf16.msra.mxu0 %v748_v25  ;;  %v2399_v25 = vld [vmem:[#allocation2 + $0x8] sm:$0xff] }
 0x1ee   : > { %851 = vmatprep.subr.bf16.mxu0 %v751_v26  ;;  %v999_v26 = vunpack.c.h.s8.bf16 %v943_v15  ;;  %v1478_v15 = vcombine.low %v2399_v25, %v2399_v25 }
 0x1ef   : > { %1036 = vmatpush1.bf16.msra.mxu1 %v975_v52  ;;  %v785_v52 = vunpack.c.h.s8.bf16 %v729_v47 }
 0x1f0   : > { %1037 = vmatprep.subr.bf16.mxu1 %v980_v53  ;;  %v731_v53 = vld [vmem:[%s2335_s16 + $0xc8] sm:$0xff] }
 0x1f1   : > { %852 = vmatpush1.bf16.msra.mxu0 %v750_v31  ;;  %v1479_v31 = vcombine.high %v2399_v25, %v2399_v25  ;;  %v789_v58 = vunpack.c.h.s8.bf16 %v731_v53  ;;  %v2426_v25 = vshrl.u32 %v815_v24, 7  ;;  %v1020_v24 = vld [vmem:[#allocation3 + $0x8] sm:$0xff] }
 0x1f2   : > { %853 = vmatprep.subr.bf16.mxu0 %v753_v32  ;;  %v773_v32 = vunpack.c.h.s8.bf16 %v723_v19 }
 0x1f3   : > { %1038 = vmatpush1.bf16.msra.mxu1 %v979_v57 }
 0x1f4   : > { %1039 = vmatprep.subr.bf16.mxu1 %v984_v59  ;;  %v733_v59 = vld [vmem:[%s2335_s16 + $0xd8] sm:$0xff] }
 0x1f5   : > { %854 = vmatpush1.bf16.msra.mxu0 %v752_v37  ;;  %v724_v37 = vld [vmem:[%s2335_s16 + $0x90] sm:$0xff] }
 0x1f6   : > { %855 = vmatprep.subr.bf16.mxu0 %v755_v38  ;;  %v1007_v38 = vunpack.c.h.s8.bf16 %v947_v28  ;;  %v774_v39 = vunpack.c.l.s8.bf16 %v724_v37  ;;  %v776_v42 = vunpack.c.h.s8.bf16 %v724_v37  ;;  %v821_v28 = vsub.s32 1, %v2426_v25  ;;  %v925_v37 = vld [vmem:[%s2348_s24 + $0x10] sm:$0xff] }
 0x1f7   : > { %1040 = vmatpush1.bf16.msra.mxu1 %v983_v0  ;;  %v793_v0 = vunpack.c.h.s8.bf16 %v733_v59 }
 0x1f8   : > { %1041 = vmatprep.subr.bf16.mxu1 %v988_v1  ;;  %v735_v1 = vld [vmem:[%s2335_s16 + $0xe8] sm:$0xff] }
 0x1f9   : > { %856 = vmatpush1.bf16.msra.mxu0 %v754_v43  ;;  %v779_v43 = vunpack.c.l.s8.bf16 %v727_v41  ;;  %v797_v6 = vunpack.c.h.s8.bf16 %v735_v1 }
 0x1fa   : > { %857 = vmatprep.subr.bf16.mxu0 %v757_v44  ;;  %v726_v44 = vld [vmem:[%s2335_s16 + $0xa0] sm:$0xff] }
 0x1fb   : > { %1042 = vmatpush1.bf16.msra.mxu1 %v987_v5  ;;  %v778_v45 = vunpack.c.l.s8.bf16 %v726_v44  ;;  %v780_v48 = vunpack.c.h.s8.bf16 %v726_v44  ;;  %v961_v44 = vunpack.c.h.s8.bf16 %v925_v37 }
 0x1fc   : > { %1043 = vmatprep.subr.bf16.mxu1 %v992_v7  ;;  %v737_v7 = vld [vmem:[%s2335_s16 + $0xf8] sm:$0xff] }
 0x1fd   : > { %858 = vmatpush1.bf16.msra.mxu0 %v756_v49  ;;  %v783_v49 = vunpack.c.l.s8.bf16 %v729_v47 }
 0x1fe   : > { %859 = vmatprep.subr.bf16.mxu0 %v759_v50  ;;  %v728_v50 = vld [vmem:[%s2335_s16 + $0xb0] sm:$0xff] }
 0x1ff   : > { %1044 = vmatpush1.bf16.msra.mxu1 %v991_v13  ;;  %v782_v51 = vunpack.c.l.s8.bf16 %v728_v50  ;;  %v784_v54 = vunpack.c.h.s8.bf16 %v728_v50  ;;  %v801_v13 = vunpack.c.h.s8.bf16 %v737_v7 }
 0x200   : > { %1045 = vmatprep.subr.bf16.mxu1 %v996_v14 }
 0x201   : > { %860 = vmatpush1.bf16.msra.mxu0 %v758_v55  ;;  %v787_v55 = vunpack.c.l.s8.bf16 %v731_v53 }
 0x202   : > { %861 = vmatprep.subr.bf16.mxu0 %v761_v56  ;;  %v730_v56 = vld [vmem:[%s2335_s16 + $0xc0] sm:$0xff] }
 0x203   : > { %1046 = vmatpush1.bf16.msra.mxu1 %v995_v18  ;;  %v786_v57 = vunpack.c.l.s8.bf16 %v730_v56  ;;  %v788_v60 = vunpack.c.h.s8.bf16 %v730_v56  ;;  %v951_v18 = vld [vmem:[%s2348_s24 + $0xe0] sm:$0xff] }
 0x204   : > { %1047 = vmatprep.subr.bf16.mxu1 %v1000_v20  ;;  %v1011_v19 = vunpack.c.l.s8.bf16 %v951_v18  ;;  %v1015_v21 = vunpack.c.h.s8.bf16 %v951_v18 }
 0x205   : > { %862 = vmatpush1.bf16.msra.mxu0 %v760_v61  ;;  %v791_v61 = vunpack.c.l.s8.bf16 %v733_v59 }
 0x206   : > { %863 = vmatprep.subr.bf16.mxu0 %v763_v62  ;;  %v732_v62 = vld [vmem:[%s2335_s16 + $0xd0] sm:$0xff] }
 0x207   : > { %1048 = vmatpush1.bf16.msra.mxu1 %v999_v26  ;;  %v790_v63 = vunpack.c.l.s8.bf16 %v732_v62  ;;  %v792_v2 = vunpack.c.h.s8.bf16 %v732_v62  ;;  %v817_v26 = vsub.s32 0, %v2426_v25 }
 0x208   : > { %1049 = vmatprep.subr.bf16.mxu1 %v1004_v27  ;;  %v811_v27 = vld [vmem:[%s810_s8] ss:$8 sm:$0x3] }
 0x209   : > { %864 = vmatpush1.bf16.msra.mxu0 %v762_v3  ;;  %v795_v3 = vunpack.c.l.s8.bf16 %v735_v1 }
 0x20a   : > { %865 = vmatprep.subr.bf16.mxu0 %v765_v4  ;;  %v734_v4 = vld [vmem:[%s2335_s16 + $0xe0] sm:$0xff] }
 0x20b   : > { %1050 = vmatpush1.bf16.msra.mxu1 %v1003_v33  ;;  %v794_v5 = vunpack.c.l.s8.bf16 %v734_v4  ;;  %v796_v9 = vunpack.c.h.s8.bf16 %v734_v4 }
 0x20c   : > { %1051 = vmatprep.subr.bf16.mxu1 %v1008_v35 }
 0x20d   : > { %866 = vmatpush1.bf16.msra.mxu0 %v764_v10  ;;  %v799_v10 = vunpack.c.l.s8.bf16 %v737_v7 }
 0x20e   : > { %867 = vmatprep.subr.bf16.mxu0 %v767_v11  ;;  %v736_v11 = vld [vmem:[%s2335_s16 + $0xf0] sm:$0xff] }
 0x20f   : > { %1052 = vmatpush1.bf16.msra.mxu1 %v1007_v38  ;;  %v798_v12 = vunpack.c.l.s8.bf16 %v736_v11  ;;  %v800_v14 = vunpack.c.h.s8.bf16 %v736_v11 }
 0x211   : > { %868 = vmatpush1.bf16.msra.mxu0 %v766_v16  ;;  %v952_v16 = vld [vmem:[%s2348_s24 + $0xe8] sm:$0xff] }
 0x212   : > { %869 = vmatprep.subr.bf16.mxu0 %v769_v17  ;;  %v1012_v17 = vunpack.c.l.s8.bf16 %v952_v16  ;;  %v1016_v20 = vunpack.c.h.s8.bf16 %v952_v16  ;;  %v954_v16 = vld [vmem:[%s2348_s24 + $0xf8] sm:$0xff] }
 0x213   : > { %v1014_v18 = vunpack.c.l.s8.bf16 %v954_v16 }
 0x214   : > { %1053 = vmatprep.subr.bf16.mxu1 %v1012_v17 }
 0x215   : > { %870 = vmatpush1.bf16.msra.mxu0 %v768_v22  ;;  %1054 = vmatpush1.bf16.msra.mxu1 %v1011_v19  ;;  %v926_v22 = vld [vmem:[%s2348_s24 + $0x18] sm:$0xff]  ;;  %v953_v19 = vld [vmem:[%s2348_s24 + $0xf0] sm:$0xff] }
 0x216   : > { %880 = vmatprep.subr.bf16.mxu0 %v771_v23  ;;  %1055 = vmatprep.subr.bf16.mxu1 %v1016_v20  ;;  %v958_v23 = vunpack.c.l.s8.bf16 %v926_v22  ;;  %v1013_v20 = vunpack.c.l.s8.bf16 %v953_v19 }
 0x218   : > { %872 = vmatmul.mubr.bf16.vlgmr.msra.gmra.mrb[0].mxu0 %v1476_v29  ;;  %v818_v29 = vrot.slane %v811_v27, %v817_v26 }
 0x219   : > { %881 = vmatpush1.bf16.msra.mxu0 %v770_v30  ;;  %912 = vmatprep.mubr.bf16.mxu0 %v1479_v31  ;;  %v822_v30 = vrot.slane %v811_v27, %v821_v28 }
 0x21a   : > { %882 = vmatprep.subr.bf16.mxu0 %v773_v32  ;;  %1056 = vmatpush1.bf16.msra.mxu1 %v1015_v21  ;;  %v1018_v21 = vunpack.c.h.s8.bf16 %v954_v16 }
 0x21b   : > { %1066 = vmatprep.subr.bf16.mxu1 %v958_v23  ;;  %v1019_v23 = vld [vmem:[#allocation3] sm:$0xff] }
 0x21d   : > { %883 = vmatpush1.bf16.msra.mxu0 %v772_v36 }
 0x21e   : > { %884 = vmatprep.subr.bf16.mxu0 %v775_v8 }
 0x221   : > { %885 = vmatpush1.bf16.msra.mxu0 %v774_v39 }
 0x222   : > { %886 = vmatprep.subr.bf16.mxu0 %v777_v40  ;;  %v957_v40 = vunpack.c.l.s8.bf16 %v925_v37 }
 0x225   : > { %887 = vmatpush1.bf16.msra.mxu0 %v776_v42  ;;  %v962_v42 = vunpack.c.h.s8.bf16 %v926_v22  ;;  %v1017_v22 = vunpack.c.h.s8.bf16 %v953_v19 }
 0x226   : > { %888 = vmatprep.subr.bf16.mxu0 %v779_v43  ;;  %v930_v43 = vld [vmem:[%s2348_s24 + $0x38] sm:$0xff] }
 0x229   : > { %889 = vmatpush1.bf16.msra.mxu0 %v778_v45  ;;  %v966_v45 = vunpack.c.l.s8.bf16 %v930_v43 }
 0x22a   : > { %890 = vmatprep.subr.bf16.mxu0 %v781_v46  ;;  %v929_v46 = vld [vmem:[%s2348_s24 + $0x30] sm:$0xff] }
 0x22b   : > { %v965_v47 = vunpack.c.l.s8.bf16 %v929_v46  ;;  %v969_v50 = vunpack.c.h.s8.bf16 %v929_v46  ;;  %v1658_v46 = vld [vmem:[%s2326_s28 + $0x48] ss:$16 sps:$4 sm:$0xff] (!%p1480_p4)  }
 0x22d   : > { %891 = vmatpush1.bf16.msra.mxu0 %v780_v48  ;;  %v970_v48 = vunpack.c.h.s8.bf16 %v930_v43  ;;  %v1655_v43 = vld [vmem:[%s2326_s28 + $0x4c] ss:$16 sps:$4 sm:$0xff] (!%p1480_p4)  }
 0x22e   : > { %892 = vmatprep.subr.bf16.mxu0 %v783_v49  ;;  %v934_v49 = vld [vmem:[%s2348_s24 + $0x58] sm:$0xff] }
 0x231   : > { %893 = vmatpush1.bf16.msra.mxu0 %v782_v51  ;;  %v974_v51 = vunpack.c.l.s8.bf16 %v934_v49 }
 0x232   : > { %894 = vmatprep.subr.bf16.mxu0 %v785_v52  ;;  %v933_v52 = vld [vmem:[%s2348_s24 + $0x50] sm:$0xff] }
 0x233   : > { %v973_v53 = vunpack.c.l.s8.bf16 %v933_v52  ;;  %v977_v56 = vunpack.c.h.s8.bf16 %v933_v52 }
 0x235   : > { %895 = vmatpush1.bf16.msra.mxu0 %v784_v54  ;;  %v978_v54 = vunpack.c.h.s8.bf16 %v934_v49 }
 0x236   : > { %896 = vmatprep.subr.bf16.mxu0 %v787_v55  ;;  %v938_v55 = vld [vmem:[%s2348_s24 + $0x78] sm:$0xff] }
 0x239   : > { %897 = vmatpush1.bf16.msra.mxu0 %v786_v57  ;;  %v982_v57 = vunpack.c.l.s8.bf16 %v938_v55 }
 0x23a   : > { %898 = vmatprep.subr.bf16.mxu0 %v789_v58  ;;  %v937_v58 = vld [vmem:[%s2348_s24 + $0x70] sm:$0xff] }
 0x23b   : > { %v981_v59 = vunpack.c.l.s8.bf16 %v937_v58  ;;  %v985_v62 = vunpack.c.h.s8.bf16 %v937_v58 }
 0x23d   : > { %899 = vmatpush1.bf16.msra.mxu0 %v788_v60  ;;  %v986_v60 = vunpack.c.h.s8.bf16 %v938_v55 }
 0x23e   : > { %900 = vmatprep.subr.bf16.mxu0 %v791_v61  ;;  %v942_v61 = vld [vmem:[%s2348_s24 + $0x98] sm:$0xff] }
 0x241   : > { %901 = vmatpush1.bf16.msra.mxu0 %v790_v63  ;;  %v990_v63 = vunpack.c.l.s8.bf16 %v942_v61 }
 0x242   : > { %902 = vmatprep.subr.bf16.mxu0 %v793_v0  ;;  %v941_v0 = vld [vmem:[%s2348_s24 + $0x90] sm:$0xff] }
 0x243   : > { %v989_v1 = vunpack.c.l.s8.bf16 %v941_v0  ;;  %v993_v4 = vunpack.c.h.s8.bf16 %v941_v0 }
 0x245   : > { %903 = vmatpush1.bf16.msra.mxu0 %v792_v2  ;;  %v994_v2 = vunpack.c.h.s8.bf16 %v942_v61 }
 0x246   : > { %904 = vmatprep.subr.bf16.mxu0 %v795_v3  ;;  %v946_v3 = vld [vmem:[%s2348_s24 + $0xb8] sm:$0xff] }
 0x249   : > { %905 = vmatpush1.bf16.msra.mxu0 %v794_v5  ;;  %v998_v5 = vunpack.c.l.s8.bf16 %v946_v3 }
 0x24a   : > { %906 = vmatprep.subr.bf16.mxu0 %v797_v6  ;;  %v945_v6 = vld [vmem:[%s2348_s24 + $0xb0] sm:$0xff] }
 0x24b   : > { %v997_v7 = vunpack.c.l.s8.bf16 %v945_v6  ;;  %v1001_v11 = vunpack.c.h.s8.bf16 %v945_v6 }
 0x24d   : > { %907 = vmatpush1.bf16.msra.mxu0 %v796_v9  ;;  %v1002_v9 = vunpack.c.h.s8.bf16 %v946_v3 }
 0x24e   : > { %908 = vmatprep.subr.bf16.mxu0 %v799_v10  ;;  %v950_v10 = vld [vmem:[%s2348_s24 + $0xd8] sm:$0xff] }
 0x251   : > { %909 = vmatpush1.bf16.msra.mxu0 %v798_v12  ;;  %v1006_v12 = vunpack.c.l.s8.bf16 %v950_v10 }
 0x252   : > { %910 = vmatprep.subr.bf16.mxu0 %v801_v13  ;;  %v949_v13 = vld [vmem:[%s2348_s24 + $0xd0] sm:$0xff] }
 0x253   : > { %v1009_v17 = vunpack.c.h.s8.bf16 %v949_v13 }
 0x255   : > { %911 = vmatpush1.bf16.msra.mxu0 %v800_v14  ;;  %v1005_v14 = vunpack.c.l.s8.bf16 %v949_v13 }
 0x256   : > { %1223 = vmatprep.subr.bf16.mxu0 (!%p1480_p4), %v1655_v43 }
 0x258   : > { %913 = vmatmul.mubr.bf16.vlgmr.msra.gmra.mrb[0].mxu0 %v1478_v15  ;;  %v1010_v15 = vunpack.c.h.s8.bf16 %v950_v10 }
 0x25e   : > { %1224 = vmatpush1.bf16.xpose.msra.mxu0 (!%p1480_p4), %v1658_v46 }
 0x32b   : > { %v914_v31 = vpop.f32.mrb[0].mxu0 }
 0x32c   : > { %v1493_v32 = vadd.f32 %v914_v31, %v818_v29  ;;  %v916_v33 = vpop.f32.mrb[1].mxu0 }
 0x32d   : > { %v1494_v34 = vadd.f32 %v916_v33, %v822_v30  ;;  %v918_v35 = vpop.f32.mrb[2].mxu0 }
 0x32e   : > { %v921_v36 = vmax.f32 %v1493_v32, 0.0  ;;  %v919_v8 = vpop.f32.mrb[3].mxu0  ;;  %v1022_v35 = vld [vmem:[#allocation3 + $0x18] sm:$0xff] }
 0x32f   : > { %v922_v38 = vmax.f32 %v1494_v34, 0.0  ;;  %v1021_v34 = vld [vmem:[#allocation3 + $0x10] sm:$0xff] }
 0x330   : > { %v2436_v41 = vpack.c.bf16 %v921_v36, %v921_v36 }
 0x331   : > { %v1024_v39 = vpack.c.bf16 %v922_v38, %v922_v38 }
 0x333   : > { %1057 = vmatprep.mubr.bf16.mxu1 %v1024_v39 }
 0x334   : > { %1058 = vmatmul.mubr.bf16.vlgmr.msra.gmra.mrb[0].mxu1 %v2436_v41 }
 0x335   : > { %1067 = vmatpush1.bf16.msra.mxu1 %v957_v40  ;;  %1098 = vmatprep.mubr.bf16.mxu1 %v1024_v39 }
 0x336   : > { %1068 = vmatprep.subr.bf16.mxu1 %v962_v42  ;;  %v1140_v42 = vsub.s32 (!%p1480_p4), 3, %v2426_v25 }
 0x339   : > { %1069 = vmatpush1.bf16.msra.mxu1 %v961_v44  ;;  %v1136_v44 = vsub.s32 (!%p1480_p4), 2, %v2426_v25  ;;  %v1162_v25 = vld [vmem:[%s2333_s12 + $0x2] ss:$0 sm:$0xff] (!%p1480_p4) }
 0x33a   : > { %1070 = vmatprep.subr.bf16.mxu1 %v966_v45  ;;  %v1657_v45 = vld [vmem:[%s2326_s28 + $0x40] ss:$16 sps:$4 sm:$0xff] (!%p1480_p4)  }
 0x33d   : > { %1071 = vmatpush1.bf16.msra.mxu1 %v965_v47 }
 0x33e   : > { %1072 = vmatprep.subr.bf16.mxu1 %v970_v48  ;;  %v1481_v48 = vld [vmem:[%s2333_s12 + $0x1] ss:$8 sm:$0xf] (!%p1480_p4) }
 0x33f   : > { %v1141_v52 = vrot.slane (!%p1480_p4), %v1481_v48, %v1140_v42  ;;  %v1137_v55 = vrot.slane (!%p1480_p4), %v1481_v48, %v1136_v44 }
 0x341   : > { %1073 = vmatpush1.bf16.msra.mxu1 %v969_v50 }
 0x342   : > { %1074 = vmatprep.subr.bf16.mxu1 %v974_v51  ;;  %v1133_v51 = vrot.slane (!%p1480_p4), %v1481_v48, %v821_v28 }
 0x345   : > { %1075 = vmatpush1.bf16.msra.mxu1 %v973_v53  ;;  %v1129_v53 = vrot.slane (!%p1480_p4), %v1481_v48, %v817_v26 }
 0x346   : > { %1076 = vmatprep.subr.bf16.mxu1 %v978_v54 }
 0x349   : > { %1077 = vmatpush1.bf16.msra.mxu1 %v977_v56 }
 0x34a   : > { %1078 = vmatprep.subr.bf16.mxu1 %v982_v57 }
 0x34d   : > { %1079 = vmatpush1.bf16.msra.mxu1 %v981_v59 }
 0x34e   : > { %1080 = vmatprep.subr.bf16.mxu1 %v986_v60 }
 0x351   : > { %1081 = vmatpush1.bf16.msra.mxu1 %v985_v62 }
 0x352   : > { %1082 = vmatprep.subr.bf16.mxu1 %v990_v63 }
 0x355   : > { %1083 = vmatpush1.bf16.msra.mxu1 %v989_v1 }
 0x356   : > { %1084 = vmatprep.subr.bf16.mxu1 %v994_v2 }
 0x359   : > { %1085 = vmatpush1.bf16.msra.mxu1 %v993_v4 }
 0x35a   : > { %1086 = vmatprep.subr.bf16.mxu1 %v998_v5 }
 0x35d   : > { %1087 = vmatpush1.bf16.msra.mxu1 %v997_v7 }
 0x35e   : > { %1088 = vmatprep.subr.bf16.mxu1 %v1002_v9 }
 0x361   : > { %1089 = vmatpush1.bf16.msra.mxu1 %v1001_v11 }
 0x362   : > { %1090 = vmatprep.subr.bf16.mxu1 %v1006_v12 }
 0x365   : > { %1091 = vmatpush1.bf16.msra.mxu1 %v1005_v14 }
 0x366   : > { %1092 = vmatprep.subr.bf16.mxu1 %v1010_v15 }
 0x369   : > { %1093 = vmatpush1.bf16.msra.mxu1 %v1009_v17 }
 0x36a   : > { %1094 = vmatprep.subr.bf16.mxu1 %v1014_v18 }
 0x36d   : > { %1095 = vmatpush1.bf16.msra.mxu1 %v1013_v20 }
 0x36e   : > { %1096 = vmatprep.subr.bf16.mxu1 %v1018_v21 }
 0x371   : > { %1097 = vmatpush1.bf16.msra.mxu1 %v1017_v22 }
 0x374   : > { %1099 = vmatmul.mubr.bf16.vlgmr.msra.gmra.mrb[4].mxu1 %v2436_v41  ;;  %v1653_v41 = vld [vmem:[%s2326_s28 + $0x44] ss:$16 sps:$4 sm:$0xff] (!%p1480_p4)  }
 0x375   : > { %1183 = vmatprep.subr.bf16.mxu1 (!%p1480_p4), %v1653_v41 }
 0x37a   : > { %1184 = vmatpush1.bf16.xpose.msra.mxu1 (!%p1480_p4), %v1657_v45 }
 0x407   : > { %v1059_v27 = vpop.f32.mrb[0].mxu1 }
 0x408   : > { %v1107_v29 = vadd.f32 %v1059_v27, %v1019_v23  ;;  %v1061_v30 = vpop.f32.mrb[1].mxu1 }
 0x409   : > { %v1108_v31 = vadd.f32 %v1061_v30, %v1020_v24  ;;  %v1063_v32 = vpop.f32.mrb[2].mxu1 }
 0x40a   : > { %1111 = vst [vmem:[#allocation3] sm:$0xff] %v1107_v29  ;;  %v1064_v33 = vpop.f32.mrb[3].mxu1 }
 0x40b   : > { %1112 = vst [vmem:[#allocation3 + $0x8] sm:$0xff] %v1108_v31 }
 0x411   : > { %v1121_v50 = vld [vmem:[#allocation3] sm:$0xff] (!%p1480_p4) }
 0x412   : > { %v1122_v47 = vld [vmem:[#allocation3 + $0x8] sm:$0xff] (!%p1480_p4)  ;;  %v1146_v58 = vadd.f32 (!%p1480_p4), %v1129_v53, %v1121_v50 }
 0x413   : > { %v1147_v56 = vadd.f32 (!%p1480_p4), %v1133_v51, %v1122_v47 }
 0x414   : > { %v1150_v62 = vmax.f32 (!%p1480_p4), %v1146_v58, 0.0 }
 0x415   : > { %v1151_v60 = vmax.f32 (!%p1480_p4), %v1147_v56, 0.0 }
 0x416   : > { %v1154_v2 = vpack.c.bf16 (!%p1480_p4), %v1150_v62, %v1150_v62 }
 0x417   : > { %v1155_v0 = vpack.c.bf16 (!%p1480_p4), %v1151_v60, %v1151_v60 }
 0x419   : > { %1215 = vmatprep.mubr.bf16.mxu1 (!%p1480_p4), %v1155_v0 }
 0x41a   : > { %1216 = vmatmul.mubr.bf16.vlgmr.msra.gmra.mrb[0].mxu1 (!%p1480_p4), %v1154_v2 }
 0x445   : > { %1118 = sbr.rel (%p1480_p4) target bundleno = 1329 (0x531), region = 76 }
 0x447   : > { %v1100_v36 = vpop.f32.mrb[4].mxu1 }
 0x448   : > { %v1109_v8 = vadd.f32 %v1100_v36, %v1021_v34  ;;  %v1102_v37 = vpop.f32.mrb[5].mxu1 }
 0x449   : > { %v1110_v38 = vadd.f32 %v1102_v37, %v1022_v35  ;;  %v1104_v39 = vpop.f32.mrb[6].mxu1 }
 0x44a   : > { %1113 = vst [vmem:[#allocation3 + $0x10] sm:$0xff] %v1109_v8  ;;  %v1105_v40 = vpop.f32.mrb[7].mxu1 }
 0x44b   : > { %1114 = vst [vmem:[#allocation3 + $0x18] sm:$0xff] %v1110_v38 }
 0x451   : > { %v1123_v54 = vld [vmem:[#allocation3 + $0x10] sm:$0xff] }
 0x452   : > { %v1124_v49 = vld [vmem:[#allocation3 + $0x18] sm:$0xff]  ;;  %v1148_v59 = vadd.f32 %v1137_v55, %v1123_v54 }
 0x453   : > { %v1149_v57 = vadd.f32 %v1141_v52, %v1124_v49 }
 0x454   : > { %v1152_v63 = vmax.f32 %v1148_v59, 0.0 }
 0x455   : > { %v1153_v61 = vmax.f32 %v1149_v57, 0.0 }
 0x456   : > { %v1156_v3 = vpack.c.bf16 %v1152_v63, %v1152_v63 }
 0x457   : > { %v1157_v1 = vpack.c.bf16 %v1153_v61, %v1153_v61 }
 0x459   : > { %1255 = vmatprep.mubr.bf16.mxu0 %v1157_v1 }
 0x45a   : > { %1256 = vmatmul.mubr.bf16.vlgmr.msra.gmra.mrb[0].mxu0 %v1156_v3 }
 0x4ed   : > { %v1217_v26 = vpop.f32.mrb[0].mxu1 }
 0x4ee   : > { %v1218_v4 = vadd.f32 %v1217_v26, %v1162_v25  ;;  %v1219_v5 = vpop.f32.mrb[1].mxu1 }
 0x4ef   : > { %v1220_v7 = vpop.f32.mrb[2].mxu1 }
 0x4f0   : > { %v1221_v11 = vpop.f32.mrb[3].mxu1 }
 0x52d   : > { %v1257_v28 = vpop.f32.mrb[0].mxu0 }
 0x52e   : > { %v1259_v6 = vpop.f32.mrb[1].mxu0  ;;  %v1258_v10 = vadd.f32 %v1257_v28, %v1218_v4 }
 0x52f   : > { %v1260_v9 = vpop.f32.mrb[2].mxu0 }
 0x530   : > { %v1261_v12 = vpop.f32.mrb[3].mxu0  ;;  %1264 = vst.msk [vmem:[%s2346_s27] sm:$0xff] %vm1263_vm2, %v1258_v10 }
 0x531 PF: > { %s18_s7 = sadd.s32 1, %s1937_s7   ;;  %s2573_s28 = sld [smem:[#allocation20_spill]] }
 0x532   : > { %p15_p8 = scmp.ge.s32.totalorder %s18_s7, 6   ;;  %s2574_s18 = sld [smem:[#allocation18_spill]] }
 0x533   : > { %s2575_s10 = sld [smem:[#allocation19_spill]]  ;;  %s2576_s21 = smov %s1901_s22 }
 0x534   : > { %s2577_s22 = smov %s1905_s23  ;;  %s2578_s23 = smov %s2224_s0 }
 0x535   : > { %s2579_s24 = smov %s1913_s25  ;;  %s2580_s25 = smov %s1917_s26 }
 0x536   : > { %s2582_s27 = smov %s1929_s29  ;;  %17 = sbr.rel (!%p15_p8) target bundleno = 13 (0xd), region = 134 }
 0x537   : > { %s2581_s26 = smov %s2573_s28  ;;  %s2583_s28 = smov %s1933_s30 }
 0x538   : > { %s2584_s29 = smov %s2574_s18 }
 0x539   : > { %s2585_s30 = smov %s2575_s10 }
 0x53d   :  { %1284 = vsyncpa [#allocation5], 1 }
 0x53e   :  { %1286 = vsyncpa [#allocation5 + $0x1], 1 }
 0x53f   :  { %1287 = vsyncpa [#allocation7], 1 }

</bundles_post_ra>
